<compile_context>
chip_gen: v7x
topology: tpu7x:2x2x1
jax: 0.10.0
libtpu: 0.0.40
codegen_flags: <defaults>
</compile_context>

<pallas_src>
import functools

import jax
import jax.numpy as jnp
from jax.experimental import pallas as pl
from jax.experimental.pallas import tpu as pltpu

N_POOL = 4  # out_pool = AdaptiveAvgPool2d(2) -> 2x2 output cells


# --------------------------------------------------------------------------
# Shared math (used by the kernel body on VMEM tiles and by the jnp mirror).
# --------------------------------------------------------------------------
def _forward_math(x_rows, wc, bc, w1, b1, wm, bm, wo, bo, *, n_pool, tb,
                  compute_dtype):
    f32 = jnp.float32
    cdt = compute_dtype
    n_lin = wc.shape[0]
    n_mid = wm.shape[0]

    # n_lin x (1x1 conv + folded BN2d + ReLU).  Activations are lane-packed:
    # rows = (out_cell, batch), lanes = (inner_cell, channel); conv weights are
    # block-diagonal so every matmul / bias-add / ReLU is full-lane dense.
    h = x_rows
    for i in range(n_lin):
        y = jnp.dot(h, wc[i], preferred_element_type=f32)
        h = jnp.maximum(y + bc[i], 0.0).astype(cdt)

    # out_pool + flatten + MLP-0 fused: the 1/group mean is folded into the
    # lane-tiled MLP-0 weights, so this is n_pool dots over contiguous,
    # sublane-aligned per-out-cell row blocks (no reshape / XLU mean pass).
    acc = jnp.dot(h[0:tb], w1[0], preferred_element_type=f32)
    for p in range(1, n_pool):
        acc = acc + jnp.dot(h[p * tb:(p + 1) * tb], w1[p],
                            preferred_element_type=f32)
    h = jnp.maximum(acc + b1, 0.0).astype(cdt)

    # remaining hidden MLP layers (Linear + folded BN1d + ReLU).
    for i in range(n_mid):
        y = jnp.dot(h, wm[i], preferred_element_type=f32)
        h = jnp.maximum(y + bm[i], 0.0).astype(cdt)

    # final classifier layer (lane-padded to a multiple of 128).
    return jnp.dot(h, wo, preferred_element_type=f32) + bo


def _mlpsr_kernel(x_ref, wc_ref, bc_ref, w1_ref, b1_ref, wm_ref, bm_ref,
                  wo_ref, bo_ref, o_ref, *, n_pool, tb, compute_dtype):
    out = _forward_math(
        x_ref[...], wc_ref[...], bc_ref[...], w1_ref[...], b1_ref[...],
        wm_ref[...], bm_ref[...], wo_ref[...], bo_ref[...],
        n_pool=n_pool, tb=tb, compute_dtype=compute_dtype)
    o_ref[...] = out.astype(o_ref.dtype)


# --------------------------------------------------------------------------
# Trace-time parameter folding (BatchNorm eval stats folded into matmuls).
# --------------------------------------------------------------------------
def _fold_params(params, *, classes, lane_pad, group, compute_dtype, eps=1e-5):
    f32 = jnp.float32
    cdt = compute_dtype
    n_lin, _, C = params["conv_w"].shape
    GC = group * C

    # conv blocks: z = x @ (s*W).T + (beta - s*mean),  s = gamma/sqrt(var+eps)
    s = params["conv_bn_gamma"] / jnp.sqrt(params["conv_bn_var"] + eps)     # (n_lin, C)
    wc_c = jnp.swapaxes(params["conv_w"] * s[:, :, None], 1, 2)             # (n_lin, Cin, Cout)
    bc_c = params["conv_bn_beta"] - s * params["conv_bn_mean"]              # (n_lin, C)
    # block-diagonal expansion over the `group` inner-pool cells packed in lanes
    eye_g = jnp.eye(group, dtype=f32)
    wc = jnp.einsum("qr,icd->iqcrd", eye_g, wc_c).reshape(n_lin, GC, GC).astype(cdt)
    bc = jnp.tile(bc_c, (1, group))[:, None, :].astype(f32)                 # (n_lin, 1, GC)

    # MLP layer 0: fold BN1d; fold the out_pool 1/group mean; tile the per-cell
    # (C, F) weight block across the `group` inner-cell lane slots.
    s0 = params["mlp_bn_gamma"][0] / jnp.sqrt(params["mlp_bn_var"][0] + eps)  # (F,)
    w0 = params["mlp_w0"].T * s0[None, :]                                     # (4C, F), rows = c*4 + p
    b0 = s0 * (params["mlp_b0"] - params["mlp_bn_mean"][0]) + params["mlp_bn_beta"][0]
    F = w0.shape[-1]
    n_pool = w0.shape[0] // C
    w1_cell = jnp.transpose(w0.reshape(C, n_pool, F), (1, 0, 2))              # (n_pool, C, F)
    w1 = (jnp.tile(w1_cell, (1, group, 1)) / group).astype(cdt)               # (n_pool, GC, F)
    b1 = b0[None, :].astype(f32)                                              # (1, F)

    # remaining hidden MLP layers.
    sm = params["mlp_bn_gamma"][1:] / jnp.sqrt(params["mlp_bn_var"][1:] + eps)  # (n_mid, F)
    wm = (jnp.swapaxes(params["mlp_w"], 1, 2) * sm[:, None, :]).astype(cdt)     # (n_mid, F, F)
    bm = (sm * (params["mlp_b"] - params["mlp_bn_mean"][1:])
          + params["mlp_bn_beta"][1:])[:, None, :].astype(f32)                  # (n_mid, 1, F)

    # output layer, zero-padded to a lane-dense width (unmasked stores).
    wo = jnp.zeros((F, lane_pad), f32).at[:, :classes].set(params["out_w"].T).astype(cdt)
    bo = jnp.zeros((1, lane_pad), f32).at[0, :classes].set(params["out_b"])
    return dict(wc=wc, bc=bc, w1=w1, b1=b1, wm=wm, bm=bm, wo=wo, bo=bo)


def _prepare_input(x, *, batch_tile, compute_dtype):
    """init_pool + lane-packed relayout.

    Returns rows of shape (T * n_pool * tb, group*C) ordered
    (batch_tile, out_cell, batch_within_tile), with lanes (inner_cell, channel),
    so the kernel's matmuls are lane-dense and the out_pool mean can be folded
    into the MLP-0 weights.
    """
    N, C, H, W = x.shape
    assert H == W and H % 4 == 0 and (H // 4) % 2 == 0, "demo supports divisible sizes"
    g = H // 4                      # init_pool output grid (AdaptiveAvgPool2d)
    k = g // 2                      # out_pool window along the pooled grid
    group = k * k
    tb = batch_tile
    T = N // tb
    # init_pool (uniform because H % g == 0): reads x exactly once.  The
    # relayout below only touches the 16x smaller pooled tensor.
    xp = x.reshape(N, C, g, H // g, g, W // g).mean(axis=(3, 5))    # (N, C, g, g)
    xr = xp.reshape(T, tb, C, 2, k, 2, k)
    xr = jnp.transpose(xr, (0, 3, 5, 1, 4, 6, 2))                   # (T, ha, wa, n', hb, wb, c)
    x_rows = xr.reshape(T * N_POOL * tb, group * C).astype(compute_dtype)
    return x_rows, group


def _pick_batch_tile(N, *, max_rows=4096):
    """Largest VMEM-friendly batch tile; prefers an even grid (2 TCs on v7x)."""
    cap = max(1, max_rows // N_POOL)
    cands = [tb for tb in range(1, N + 1)
             if N % tb == 0 and tb <= cap and (tb == N or tb % 8 == 0)]
    if not cands:
        return N
    even = [tb for tb in cands if (N // tb) % 2 == 0]
    return max(even) if even else max(cands)


# --------------------------------------------------------------------------
# Public forward.
# --------------------------------------------------------------------------
def mlpsr_forward(x, params, *, classes, compute_dtype=jnp.bfloat16,
                  batch_tile=None):
    N, C, H, W = x.shape
    n_lin = params["conv_w"].shape[0]
    mlp_layers = params["mlp_bn_gamma"].shape[0]
    n_mid = mlp_layers - 1
    assert n_mid >= 1, "this implementation expects mlp_layers >= 2"

    if batch_tile is None:
        batch_tile = _pick_batch_tile(N)
    tb = batch_tile
    # TODO(synk): pad the batch instead of requiring divisibility by the tile.
    assert N % tb == 0, "batch must be divisible by the batch tile"

    lane_pad = ((classes + 127) // 128) * 128
    x_rows, group = _prepare_input(x, batch_tile=tb, compute_dtype=compute_dtype)
    GC = group * C
    # TODO(synk): very large group*C (e.g. channels=256, size=32 -> 4096) would
    #             need a partially-packed layout; not implemented here.
    assert GC <= 1024, "lane-packed layout assumes group*channels <= 1024"

    prep = _fold_params(params, classes=classes, lane_pad=lane_pad,
                        group=group, compute_dtype=compute_dtype)
    F = prep["w1"].shape[-1]
    n_pool = prep["w1"].shape[0]
    assert n_pool == N_POOL

    grid = (N // tb,)
    rows = tb * n_pool

    kernel = functools.partial(_mlpsr_kernel, n_pool=n_pool, tb=tb,
                               compute_dtype=compute_dtype)
    out = pl.pallas_call(
        kernel,
        out_shape=jax.ShapeDtypeStruct((N, lane_pad), jnp.float32),
        grid=grid,
        in_specs=[
            pl.BlockSpec((rows, GC), lambda b: (b, 0)),           # packed activations
            pl.BlockSpec((n_lin, GC, GC), lambda b: (0, 0, 0)),   # block-diag conv weights
            pl.BlockSpec((n_lin, 1, GC), lambda b: (0, 0, 0)),    # conv biases
            pl.BlockSpec((n_pool, GC, F), lambda b: (0, 0, 0)),   # MLP-0 weight stack
            pl.BlockSpec((1, F), lambda b: (0, 0)),               # MLP-0 bias
            pl.BlockSpec((n_mid, F, F), lambda b: (0, 0, 0)),     # hidden MLP weights
            pl.BlockSpec((n_mid, 1, F), lambda b: (0, 0, 0)),     # hidden MLP biases
            pl.BlockSpec((F, lane_pad), lambda b: (0, 0)),        # head weight (padded)
            pl.BlockSpec((1, lane_pad), lambda b: (0, 0)),        # head bias (padded)
        ],
        out_specs=pl.BlockSpec((tb, lane_pad), lambda b: (b, 0)),
        compiler_params=pltpu.CompilerParams(
            dimension_semantics=("parallel",),
            vmem_limit_bytes=64 * 1024 * 1024,
        ),
    )(x_rows, prep["wc"], prep["bc"], prep["w1"], prep["b1"],
      prep["wm"], prep["bm"], prep["wo"], prep["bo"])
    return out[:, :classes]


# --------------------------------------------------------------------------
# References.
# --------------------------------------------------------------------------
def _mirror_reference(x, params, *, classes, compute_dtype):
    """Pure-jnp mirror of the kernel math (same folding, same dtype casts)."""
    N, C = x.shape[0], x.shape[1]
    lane_pad = ((classes + 127) // 128) * 128
    x_rows, group = _prepare_input(x, batch_tile=N, compute_dtype=compute_dtype)
    prep = _fold_params(params, classes=classes, lane_pad=lane_pad,
                        group=group, compute_dtype=compute_dtype)
    out = _forward_math(x_rows, prep["wc"], prep["bc"], prep["w1"], prep["b1"],
                        prep["wm"], prep["bm"], prep["wo"], prep["bo"],
                        n_pool=N_POOL, tb=N, compute_dtype=compute_dtype)
    return out[:, :classes]


def _reference_f32(x, params, *, classes, eps=1e-5):
    """Direct float32 transcription of the PyTorch MLPSR forward (eval mode)."""
    N, C, H, W = x.shape
    g = H // 4
    n_lin = params["conv_w"].shape[0]
    mlp_layers = params["mlp_bn_gamma"].shape[0]

    out = x.reshape(N, C, g, H // g, g, W // g).mean(axis=(3, 5))      # init_pool
    for i in range(n_lin):
        out = jnp.einsum("oc,nchw->nohw", params["conv_w"][i], out)    # 1x1 conv
        s = params["conv_bn_gamma"][i] / jnp.sqrt(params["conv_bn_var"][i] + eps)
        out = (s[:, None, None] * (out - params["conv_bn_mean"][i][:, None, None])
               + params["conv_bn_beta"][i][:, None, None])
        out = jnp.maximum(out, 0.0)
    k = g // 2
    out = out.reshape(N, C, 2, k, 2, k).mean(axis=(3, 5))              # out_pool
    out = out.reshape(N, C * 4)                                        # torch .view(N, -1)
    for l in range(mlp_layers):
        wl = params["mlp_w0"] if l == 0 else params["mlp_w"][l - 1]
        bl = params["mlp_b0"] if l == 0 else params["mlp_b"][l - 1]
        out = out @ wl.T + bl
        s = params["mlp_bn_gamma"][l] / jnp.sqrt(params["mlp_bn_var"][l] + eps)
        out = s * (out - params["mlp_bn_mean"][l]) + params["mlp_bn_beta"][l]
        out = jnp.maximum(out, 0.0)
    return out @ params["out_w"].T + params["out_b"]


# --------------------------------------------------------------------------
# Demo / self-check.
# --------------------------------------------------------------------------
if __name__ == "__main__":
    N, C, H, W = 16, 32, 16, 16          # small MLPSR config: channels=32, size=16
    classes, n_lin, mlp_layers = 10, 3, 3
    mlp_in = 2
    F = C * mlp_in * mlp_in              # 128

    key = jax.random.PRNGKey(0)
    ks = jax.random.split(key, 16)
    nrm = jax.random.normal
    uni = jax.random.uniform

    x = 4.0 * nrm(ks[0], (N, C, H, W), jnp.float32)

    params = {
        "conv_w": nrm(ks[1], (n_lin, C, C), jnp.float32) * jnp.sqrt(2.0 / C),
        "conv_bn_gamma": 1.0 + 0.1 * nrm(ks[2], (n_lin, C), jnp.float32),
        "conv_bn_beta": 0.1 * nrm(ks[3], (n_lin, C), jnp.float32),
        "conv_bn_mean": 0.1 * nrm(ks[4], (n_lin, C), jnp.float32),
        "conv_bn_var": uni(ks[5], (n_lin, C), jnp.float32, 0.8, 1.2),
        "mlp_w0": nrm(ks[6], (F, C * 4), jnp.float32) * jnp.sqrt(2.0 / (C * 4)),
        "mlp_b0": 0.1 * nrm(ks[7], (F,), jnp.float32),
        "mlp_w": nrm(ks[8], (mlp_layers - 1, F, F), jnp.float32) * jnp.sqrt(2.0 / F),
        "mlp_b": 0.1 * nrm(ks[9], (mlp_layers - 1, F), jnp.float32),
        "mlp_bn_gamma": 1.0 + 0.1 * nrm(ks[10], (mlp_layers, F), jnp.float32),
        "mlp_bn_beta": 0.1 * nrm(ks[11], (mlp_layers, F), jnp.float32),
        "mlp_bn_mean": 0.1 * nrm(ks[12], (mlp_layers, F), jnp.float32),
        "mlp_bn_var": uni(ks[13], (mlp_layers, F), jnp.float32, 0.8, 1.2),
        "out_w": nrm(ks[14], (classes, F), jnp.float32) * (2.0 / jnp.sqrt(F)),
        "out_b": 0.1 * nrm(ks[15], (classes,), jnp.float32),
    }

    fwd = jax.jit(functools.partial(mlpsr_forward, classes=classes,
                                    compute_dtype=jnp.bfloat16))
    out = jax.block_until_ready(fwd(x, params))
    assert out.shape == (N, classes)

    # 1) tight check vs. a jnp mirror of the exact kernel math (same bf16 casts)
    ref_mirror = _mirror_reference(x, params, classes=classes,
                                   compute_dtype=jnp.bfloat16)
    assert jnp.allclose(out, ref_mirror, atol=2e-3, rtol=2e-3)

    # 2) independent check vs. a float32 transcription of the PyTorch forward
    ref_f32 = _reference_f32(x, params, classes=classes)
    rel = jnp.linalg.norm(out - ref_f32) / (jnp.linalg.norm(ref_f32) + 1e-12)
    assert float(rel) < 0.05

    print("KERNEL_OK")
</pallas_src>

<mosaic_0001>
module attributes {stable_mosaic.version = 11 : i64} {
  func.func @_mlpsr_kernel(%arg0: i32, %arg1: memref<32x128xbf16, #tpu.memory_space<vmem>>, %arg2: memref<3x128x128xbf16, #tpu.memory_space<vmem>>, %arg3: memref<3x1x128xf32, #tpu.memory_space<vmem>>, %arg4: memref<4x128x128xbf16, #tpu.memory_space<vmem>>, %arg5: memref<1x128xf32, #tpu.memory_space<vmem>>, %arg6: memref<2x128x128xbf16, #tpu.memory_space<vmem>>, %arg7: memref<2x1x128xf32, #tpu.memory_space<vmem>>, %arg8: memref<128x128xbf16, #tpu.memory_space<vmem>>, %arg9: memref<1x128xf32, #tpu.memory_space<vmem>>, %arg10: memref<8x128xf32, #tpu.memory_space<vmem>>) attributes {dimension_semantics = [#tpu.dimension_semantics<parallel>], iteration_bounds = array<i64: 2>, scalar_prefetch = 0 : i64, scratch_operands = 0 : i64, tpu.core_type = #tpu.core_type<tc>, window_params = [{transform_indices = @transform_0, window_bounds = array<i64: 32, 128>}, {pipeline_mode = #tpu.pipeline_mode<synchronous>, transform_indices = @transform_1, window_bounds = array<i64: 3, 128, 128>}, {pipeline_mode = #tpu.pipeline_mode<synchronous>, transform_indices = @transform_2, window_bounds = array<i64: 3, 1, 128>}, {pipeline_mode = #tpu.pipeline_mode<synchronous>, transform_indices = @transform_3, window_bounds = array<i64: 4, 128, 128>}, {pipeline_mode = #tpu.pipeline_mode<synchronous>, transform_indices = @transform_4, window_bounds = array<i64: 1, 128>}, {pipeline_mode = #tpu.pipeline_mode<synchronous>, transform_indices = @transform_5, window_bounds = array<i64: 2, 128, 128>}, {pipeline_mode = #tpu.pipeline_mode<synchronous>, transform_indices = @transform_6, window_bounds = array<i64: 2, 1, 128>}, {pipeline_mode = #tpu.pipeline_mode<synchronous>, transform_indices = @transform_7, window_bounds = array<i64: 128, 128>}, {pipeline_mode = #tpu.pipeline_mode<synchronous>, transform_indices = @transform_8, window_bounds = array<i64: 1, 128>}, {transform_indices = @transform_9, window_bounds = array<i64: 8, 128>}]} {
    %c0 = arith.constant 0 : index
    %c0_0 = arith.constant 0 : index
    %0 = vector.load %arg1[%c0, %c0_0] : memref<32x128xbf16, #tpu.memory_space<vmem>>, vector<32x128xbf16>
    %c0_1 = arith.constant 0 : index
    %c0_2 = arith.constant 0 : index
    %c0_3 = arith.constant 0 : index
    %1 = vector.load %arg2[%c0_1, %c0_2, %c0_3] : memref<3x128x128xbf16, #tpu.memory_space<vmem>>, vector<3x128x128xbf16>
    %c0_4 = arith.constant 0 : index
    %c0_5 = arith.constant 0 : index
    %c0_6 = arith.constant 0 : index
    %2 = vector.load %arg3[%c0_4, %c0_5, %c0_6] : memref<3x1x128xf32, #tpu.memory_space<vmem>>, vector<3x1x128xf32>
    %c0_7 = arith.constant 0 : index
    %c0_8 = arith.constant 0 : index
    %c0_9 = arith.constant 0 : index
    %3 = vector.load %arg4[%c0_7, %c0_8, %c0_9] : memref<4x128x128xbf16, #tpu.memory_space<vmem>>, vector<4x128x128xbf16>
    %c0_10 = arith.constant 0 : index
    %c0_11 = arith.constant 0 : index
    %4 = vector.load %arg5[%c0_10, %c0_11] : memref<1x128xf32, #tpu.memory_space<vmem>>, vector<1x128xf32>
    %c0_12 = arith.constant 0 : index
    %c0_13 = arith.constant 0 : index
    %c0_14 = arith.constant 0 : index
    %5 = vector.load %arg6[%c0_12, %c0_13, %c0_14] : memref<2x128x128xbf16, #tpu.memory_space<vmem>>, vector<2x128x128xbf16>
    %c0_15 = arith.constant 0 : index
    %c0_16 = arith.constant 0 : index
    %c0_17 = arith.constant 0 : index
    %6 = vector.load %arg7[%c0_15, %c0_16, %c0_17] : memref<2x1x128xf32, #tpu.memory_space<vmem>>, vector<2x1x128xf32>
    %c0_18 = arith.constant 0 : index
    %c0_19 = arith.constant 0 : index
    %7 = vector.load %arg8[%c0_18, %c0_19] : memref<128x128xbf16, #tpu.memory_space<vmem>>, vector<128x128xbf16>
    %c0_20 = arith.constant 0 : index
    %c0_21 = arith.constant 0 : index
    %8 = vector.load %arg9[%c0_20, %c0_21] : memref<1x128xf32, #tpu.memory_space<vmem>>, vector<1x128xf32>
    %9 = vector.extract_strided_slice %1 {offsets = [0, 0, 0], sizes = [1, 128, 128], strides = [1, 1, 1]} : vector<3x128x128xbf16> to vector<1x128x128xbf16>
    %10 = vector.shape_cast %9 : vector<1x128x128xbf16> to vector<128x128xbf16>
    %cst = arith.constant dense<0.000000e+00> : vector<32x128xf32>
    %11 = tpu.matmul %0, %10, %cst {dimension_numbers = #tpu.dot_dimension_numbers<[1], [0], [0], [1], [0, 0, 1, 1], [], []>} : vector<32x128xbf16>, vector<128x128xbf16>, vector<32x128xf32> -> vector<32x128xf32>
    %12 = vector.extract_strided_slice %2 {offsets = [0, 0, 0], sizes = [1, 1, 128], strides = [1, 1, 1]} : vector<3x1x128xf32> to vector<1x1x128xf32>
    %13 = vector.shape_cast %12 : vector<1x1x128xf32> to vector<1x128xf32>
    %14 = vector.broadcast %13 : vector<1x128xf32> to vector<32x128xf32>
    %15 = arith.addf %11, %14 : vector<32x128xf32>
    %cst_22 = arith.constant 0.000000e+00 : f32
    %16 = vector.broadcast %cst_22 : f32 to vector<32x128xf32>
    %17 = arith.maximumf %15, %16 : vector<32x128xf32>
    %18 = arith.truncf %17 : vector<32x128xf32> to vector<32x128xbf16>
    %19 = vector.extract_strided_slice %1 {offsets = [1, 0, 0], sizes = [1, 128, 128], strides = [1, 1, 1]} : vector<3x128x128xbf16> to vector<1x128x128xbf16>
    %20 = vector.shape_cast %19 : vector<1x128x128xbf16> to vector<128x128xbf16>
    %cst_23 = arith.constant dense<0.000000e+00> : vector<32x128xf32>
    %21 = tpu.matmul %18, %20, %cst_23 {dimension_numbers = #tpu.dot_dimension_numbers<[1], [0], [0], [1], [0, 0, 1, 1], [], []>} : vector<32x128xbf16>, vector<128x128xbf16>, vector<32x128xf32> -> vector<32x128xf32>
    %22 = vector.extract_strided_slice %2 {offsets = [1, 0, 0], sizes = [1, 1, 128], strides = [1, 1, 1]} : vector<3x1x128xf32> to vector<1x1x128xf32>
    %23 = vector.shape_cast %22 : vector<1x1x128xf32> to vector<1x128xf32>
    %24 = vector.broadcast %23 : vector<1x128xf32> to vector<32x128xf32>
    %25 = arith.addf %21, %24 : vector<32x128xf32>
    %cst_24 = arith.constant 0.000000e+00 : f32
    %26 = vector.broadcast %cst_24 : f32 to vector<32x128xf32>
    %27 = arith.maximumf %25, %26 : vector<32x128xf32>
    %28 = arith.truncf %27 : vector<32x128xf32> to vector<32x128xbf16>
    %29 = vector.extract_strided_slice %1 {offsets = [2, 0, 0], sizes = [1, 128, 128], strides = [1, 1, 1]} : vector<3x128x128xbf16> to vector<1x128x128xbf16>
    %30 = vector.shape_cast %29 : vector<1x128x128xbf16> to vector<128x128xbf16>
    %cst_25 = arith.constant dense<0.000000e+00> : vector<32x128xf32>
    %31 = tpu.matmul %28, %30, %cst_25 {dimension_numbers = #tpu.dot_dimension_numbers<[1], [0], [0], [1], [0, 0, 1, 1], [], []>} : vector<32x128xbf16>, vector<128x128xbf16>, vector<32x128xf32> -> vector<32x128xf32>
    %32 = vector.extract_strided_slice %2 {offsets = [2, 0, 0], sizes = [1, 1, 128], strides = [1, 1, 1]} : vector<3x1x128xf32> to vector<1x1x128xf32>
    %33 = vector.shape_cast %32 : vector<1x1x128xf32> to vector<1x128xf32>
    %34 = vector.broadcast %33 : vector<1x128xf32> to vector<32x128xf32>
    %35 = arith.addf %31, %34 : vector<32x128xf32>
    %cst_26 = arith.constant 0.000000e+00 : f32
    %36 = vector.broadcast %cst_26 : f32 to vector<32x128xf32>
    %37 = arith.maximumf %35, %36 : vector<32x128xf32>
    %38 = arith.truncf %37 : vector<32x128xf32> to vector<32x128xbf16>
    %39 = vector.extract_strided_slice %38 {offsets = [0, 0], sizes = [8, 128], strides = [1, 1]} : vector<32x128xbf16> to vector<8x128xbf16>
    %40 = vector.extract_strided_slice %3 {offsets = [0, 0, 0], sizes = [1, 128, 128], strides = [1, 1, 1]} : vector<4x128x128xbf16> to vector<1x128x128xbf16>
    %41 = vector.shape_cast %40 : vector<1x128x128xbf16> to vector<128x128xbf16>
    %cst_27 = arith.constant dense<0.000000e+00> : vector<8x128xf32>
    %42 = tpu.matmul %39, %41, %cst_27 {dimension_numbers = #tpu.dot_dimension_numbers<[1], [0], [0], [1], [0, 0, 1, 1], [], []>} : vector<8x128xbf16>, vector<128x128xbf16>, vector<8x128xf32> -> vector<8x128xf32>
    %43 = vector.extract_strided_slice %38 {offsets = [8, 0], sizes = [8, 128], strides = [1, 1]} : vector<32x128xbf16> to vector<8x128xbf16>
    %44 = vector.extract_strided_slice %3 {offsets = [1, 0, 0], sizes = [1, 128, 128], strides = [1, 1, 1]} : vector<4x128x128xbf16> to vector<1x128x128xbf16>
    %45 = vector.shape_cast %44 : vector<1x128x128xbf16> to vector<128x128xbf16>
    %cst_28 = arith.constant dense<0.000000e+00> : vector<8x128xf32>
    %46 = tpu.matmul %43, %45, %cst_28 {dimension_numbers = #tpu.dot_dimension_numbers<[1], [0], [0], [1], [0, 0, 1, 1], [], []>} : vector<8x128xbf16>, vector<128x128xbf16>, vector<8x128xf32> -> vector<8x128xf32>
    %47 = arith.addf %42, %46 : vector<8x128xf32>
    %48 = vector.extract_strided_slice %38 {offsets = [16, 0], sizes = [8, 128], strides = [1, 1]} : vector<32x128xbf16> to vector<8x128xbf16>
    %49 = vector.extract_strided_slice %3 {offsets = [2, 0, 0], sizes = [1, 128, 128], strides = [1, 1, 1]} : vector<4x128x128xbf16> to vector<1x128x128xbf16>
    %50 = vector.shape_cast %49 : vector<1x128x128xbf16> to vector<128x128xbf16>
    %cst_29 = arith.constant dense<0.000000e+00> : vector<8x128xf32>
    %51 = tpu.matmul %48, %50, %cst_29 {dimension_numbers = #tpu.dot_dimension_numbers<[1], [0], [0], [1], [0, 0, 1, 1], [], []>} : vector<8x128xbf16>, vector<128x128xbf16>, vector<8x128xf32> -> vector<8x128xf32>
    %52 = arith.addf %47, %51 : vector<8x128xf32>
    %53 = vector.extract_strided_slice %38 {offsets = [24, 0], sizes = [8, 128], strides = [1, 1]} : vector<32x128xbf16> to vector<8x128xbf16>
    %54 = vector.extract_strided_slice %3 {offsets = [3, 0, 0], sizes = [1, 128, 128], strides = [1, 1, 1]} : vector<4x128x128xbf16> to vector<1x128x128xbf16>
    %55 = vector.shape_cast %54 : vector<1x128x128xbf16> to vector<128x128xbf16>
    %cst_30 = arith.constant dense<0.000000e+00> : vector<8x128xf32>
    %56 = tpu.matmul %53, %55, %cst_30 {dimension_numbers = #tpu.dot_dimension_numbers<[1], [0], [0], [1], [0, 0, 1, 1], [], []>} : vector<8x128xbf16>, vector<128x128xbf16>, vector<8x128xf32> -> vector<8x128xf32>
    %57 = arith.addf %52, %56 : vector<8x128xf32>
    %58 = vector.broadcast %4 : vector<1x128xf32> to vector<8x128xf32>
    %59 = arith.addf %57, %58 : vector<8x128xf32>
    %cst_31 = arith.constant 0.000000e+00 : f32
    %60 = vector.broadcast %cst_31 : f32 to vector<8x128xf32>
    %61 = arith.maximumf %59, %60 : vector<8x128xf32>
    %62 = arith.truncf %61 : vector<8x128xf32> to vector<8x128xbf16>
    %63 = vector.extract_strided_slice %5 {offsets = [0, 0, 0], sizes = [1, 128, 128], strides = [1, 1, 1]} : vector<2x128x128xbf16> to vector<1x128x128xbf16>
    %64 = vector.shape_cast %63 : vector<1x128x128xbf16> to vector<128x128xbf16>
    %cst_32 = arith.constant dense<0.000000e+00> : vector<8x128xf32>
    %65 = tpu.matmul %62, %64, %cst_32 {dimension_numbers = #tpu.dot_dimension_numbers<[1], [0], [0], [1], [0, 0, 1, 1], [], []>} : vector<8x128xbf16>, vector<128x128xbf16>, vector<8x128xf32> -> vector<8x128xf32>
    %66 = vector.extract_strided_slice %6 {offsets = [0, 0, 0], sizes = [1, 1, 128], strides = [1, 1, 1]} : vector<2x1x128xf32> to vector<1x1x128xf32>
    %67 = vector.shape_cast %66 : vector<1x1x128xf32> to vector<1x128xf32>
    %68 = vector.broadcast %67 : vector<1x128xf32> to vector<8x128xf32>
    %69 = arith.addf %65, %68 : vector<8x128xf32>
    %cst_33 = arith.constant 0.000000e+00 : f32
    %70 = vector.broadcast %cst_33 : f32 to vector<8x128xf32>
    %71 = arith.maximumf %69, %70 : vector<8x128xf32>
    %72 = arith.truncf %71 : vector<8x128xf32> to vector<8x128xbf16>
    %73 = vector.extract_strided_slice %5 {offsets = [1, 0, 0], sizes = [1, 128, 128], strides = [1, 1, 1]} : vector<2x128x128xbf16> to vector<1x128x128xbf16>
    %74 = vector.shape_cast %73 : vector<1x128x128xbf16> to vector<128x128xbf16>
    %cst_34 = arith.constant dense<0.000000e+00> : vector<8x128xf32>
    %75 = tpu.matmul %72, %74, %cst_34 {dimension_numbers = #tpu.dot_dimension_numbers<[1], [0], [0], [1], [0, 0, 1, 1], [], []>} : vector<8x128xbf16>, vector<128x128xbf16>, vector<8x128xf32> -> vector<8x128xf32>
    %76 = vector.extract_strided_slice %6 {offsets = [1, 0, 0], sizes = [1, 1, 128], strides = [1, 1, 1]} : vector<2x1x128xf32> to vector<1x1x128xf32>
    %77 = vector.shape_cast %76 : vector<1x1x128xf32> to vector<1x128xf32>
    %78 = vector.broadcast %77 : vector<1x128xf32> to vector<8x128xf32>
    %79 = arith.addf %75, %78 : vector<8x128xf32>
    %cst_35 = arith.constant 0.000000e+00 : f32
    %80 = vector.broadcast %cst_35 : f32 to vector<8x128xf32>
    %81 = arith.maximumf %79, %80 : vector<8x128xf32>
    %82 = arith.truncf %81 : vector<8x128xf32> to vector<8x128xbf16>
    %cst_36 = arith.constant dense<0.000000e+00> : vector<8x128xf32>
    %83 = tpu.matmul %82, %7, %cst_36 {dimension_numbers = #tpu.dot_dimension_numbers<[1], [0], [0], [1], [0, 0, 1, 1], [], []>} : vector<8x128xbf16>, vector<128x128xbf16>, vector<8x128xf32> -> vector<8x128xf32>
    %84 = vector.broadcast %8 : vector<1x128xf32> to vector<8x128xf32>
    %85 = arith.addf %83, %84 : vector<8x128xf32>
    %c0_37 = arith.constant 0 : index
    %c0_38 = arith.constant 0 : index
    %86 = vector.load %arg10[%c0_37, %c0_38] : memref<8x128xf32, #tpu.memory_space<vmem>>, vector<8x128xf32>
    tpu.vector_store %arg10[%c0_37, %c0_38], %85 {strides = array<i32>} : memref<8x128xf32, #tpu.memory_space<vmem>>, vector<8x128xf32>,
    return
  }
  func.func @transform_0(%arg0: i32) -> (i32, i32) {
    %c0_i32 = arith.constant 0 : i32
    %c0_i32_0 = arith.constant 0 : i32
    return %arg0, %c0_i32 : i32, i32
  }
  func.func @transform_1(%arg0: i32) -> (i32, i32, i32) {
    %c0_i32 = arith.constant 0 : i32
    %c0_i32_0 = arith.constant 0 : i32
    %c0_i32_1 = arith.constant 0 : i32
    %c0_i32_2 = arith.constant 0 : i32
    return %c0_i32, %c0_i32_0, %c0_i32_1 : i32, i32, i32
  }
  func.func @transform_2(%arg0: i32) -> (i32, i32, i32) {
    %c0_i32 = arith.constant 0 : i32
    %c0_i32_0 = arith.constant 0 : i32
    %c0_i32_1 = arith.constant 0 : i32
    %c0_i32_2 = arith.constant 0 : i32
    return %c0_i32, %c0_i32_0, %c0_i32_1 : i32, i32, i32
  }
  func.func @transform_3(%arg0: i32) -> (i32, i32, i32) {
    %c0_i32 = arith.constant 0 : i32
    %c0_i32_0 = arith.constant 0 : i32
    %c0_i32_1 = arith.constant 0 : i32
    %c0_i32_2 = arith.constant 0 : i32
    return %c0_i32, %c0_i32_0, %c0_i32_1 : i32, i32, i32
  }
  func.func @transform_4(%arg0: i32) -> (i32, i32) {
    %c0_i32 = arith.constant 0 : i32
    %c0_i32_0 = arith.constant 0 : i32
    %c0_i32_1 = arith.constant 0 : i32
    return %c0_i32, %c0_i32_0 : i32, i32
  }
  func.func @transform_5(%arg0: i32) -> (i32, i32, i32) {
    %c0_i32 = arith.constant 0 : i32
    %c0_i32_0 = arith.constant 0 : i32
    %c0_i32_1 = arith.constant 0 : i32
    %c0_i32_2 = arith.constant 0 : i32
    return %c0_i32, %c0_i32_0, %c0_i32_1 : i32, i32, i32
  }
  func.func @transform_6(%arg0: i32) -> (i32, i32, i32) {
    %c0_i32 = arith.constant 0 : i32
    %c0_i32_0 = arith.constant 0 : i32
    %c0_i32_1 = arith.constant 0 : i32
    %c0_i32_2 = arith.constant 0 : i32
    return %c0_i32, %c0_i32_0, %c0_i32_1 : i32, i32, i32
  }
  func.func @transform_7(%arg0: i32) -> (i32, i32) {
    %c0_i32 = arith.constant 0 : i32
    %c0_i32_0 = arith.constant 0 : i32
    %c0_i32_1 = arith.constant 0 : i32
    return %c0_i32, %c0_i32_0 : i32, i32
  }
  func.func @transform_8(%arg0: i32) -> (i32, i32) {
    %c0_i32 = arith.constant 0 : i32
    %c0_i32_0 = arith.constant 0 : i32
    %c0_i32_1 = arith.constant 0 : i32
    return %c0_i32, %c0_i32_0 : i32, i32
  }
  func.func @transform_9(%arg0: i32) -> (i32, i32) {
    %c0_i32 = arith.constant 0 : i32
    %c0_i32_0 = arith.constant 0 : i32
    return %arg0, %c0_i32 : i32, i32
  }
}

</mosaic_0001>

<bundles_post_ra>
// kernel: mlpsr_forward.1
= control target key start
LH: loop header
LB: loop body
LE: loop exit
PB: predicated region body
PF: predicated region fallthrough
CT: control target
= control target key end

     0   :  { %s3281_s0 = inlined_call_operand.hbm [shape: bf16[64,128], index: 0, kind: input, shape index: {}]   ;;  %s3282_s1 = inlined_call_operand.hbm [shape: bf16[3,128,128], index: 1, kind: input, shape index: {}]   ;;  %s3283_s2 = inlined_call_operand.hbm [shape: f32[3,1,128], index: 2, kind: input, shape index: {}]   ;;  %s3284_s3 = inlined_call_operand.hbm [shape: bf16[4,128,128], index: 3, kind: input, shape index: {}]   ;;  %s3285_s4 = inlined_call_operand.hbm [shape: f32[1,128], index: 4, kind: input, shape index: {}]   ;;  %s3286_s5 = inlined_call_operand.hbm [shape: bf16[2,128,128], index: 5, kind: input, shape index: {}]   ;;  %s3287_s6 = inlined_call_operand.hbm [shape: f32[2,1,128], index: 6, kind: input, shape index: {}]   ;;  %s3288_s7 = inlined_call_operand.hbm [shape: bf16[128,128], index: 7, kind: input, shape index: {}]   ;;  %s3289_s8 = inlined_call_operand.hbm [shape: f32[1,128], index: 8, kind: input, shape index: {}]   ;;  %s3290_s9 = inlined_call_operand.hbm [shape: f32[16,128], index: 9, kind: output, shape index: {}]  }
   0x1   :  { %3297 = sst [smem:[#allocation24_spill]] %s3282_s1 }
   0x2   :  { %3298 = sst [smem:[#allocation25_spill]] %s3284_s3 }
   0x3   :  { %3299 = sst [smem:[#allocation26_spill]] %s3290_s9 }
   0x4   :  { %14 = vsyncpa [#allocation3], 0 }
   0x5   :  { %16 = vsyncpa [#allocation3 + $0x1], 0 }
   0x6   :  { %17 = vsyncpa [#allocation6], 0 }
   0x7   :  { %18 = vsyncpa [#allocation9], 0 }
   0x8   :  { %19 = vsyncpa [#allocation12], 0 }
   0x9   :  { %20 = vsyncpa [#allocation15], 0 }
   0xa   :  { %21 = vsyncpa [#allocation4], 0 }
   0xb   :  { %23 = vsyncpa [#allocation4 + $0x1], 0  ;;  %s2822_s30 = smov 0   ;;  %s2824_s10 = smov 0  }
   0xc   :  { %s2826_s11 = smov 0   ;;  %s2828_s12 = smov 0  }
   0xd LB: > { %s2756_s13 = smov [#allocation5]   ;;  %s2843_s15 = sadd.s32 4294967295, %s2754_s12   ;;  %s2754_s12 = sphi %s2828_s12, %s3329_s12   ;;  %s2750_s11 = sphi %s2826_s11, %s3328_s11   ;;  %s2746_s10 = sphi %s2824_s10, %s3327_s10   ;;  %s2742_s30 = sphi %s2822_s30, %s3326_s30  }
   0xe   : > { %s266_s14 = sshll.u32 %s2756_s13, 4  ;;  %p1792_p0 = scmp.ge.s32.totalorder %s2754_s12, 1  ;;  %s2848_s14 = int_to_ptr.vmem [resolvable:$true] %s266_s14 }
   0xf   : > { %p3292_p1 = scmp.eq.s32.totalorder %s2843_s15, 0  ;;  %p254_p2 = scmp.lt.s32.totalorder %s2754_s12, 3 }
  0x10   : > { %s2757_s17 = smov [#allocation8]   ;;  %s2758_s20 = smov [#allocation11]  }
  0x11   : > { %p2850_p3 = pnand %p1792_p0, %p254_p2  ;;  %s292_s18 = sshll.u32 %s2757_s17, 4  ;;  %s2863_s18 = int_to_ptr.vmem [resolvable:$true] %s292_s18 }
  0x12   : > { %s316_s21 = sshll.u32 %s2758_s20, 4  ;;  %s3302_s1 = sld [smem:[#allocation24_spill]]  ;;  %s2865_s21 = int_to_ptr.vmem [resolvable:$true] %s316_s21 }
  0x13   : > { %s3300_s16 = scalar_select %p2850_p3, 1, 0 }
  0x14   : > { %p2239_p5 = pneg %p2850_p3 }
  0x16   : > { %p2859_p6 = pnand %p2239_p5, %p3292_p1 }
  0x18   : > { %s2418_s24 = scalar_lea.hbm %s3302_s1, 3072  ;;  %p2875_p8 = pneg %p2859_p6 }
  0x19   : > { %p2419_p7 = scmp.ne.s32.totalorder %s3302_s1, %s2418_s24  ;;  %p2425_p11 = scmp.lt.u32.totalorder %s2418_s24, %s3302_s1 }
  0x1b   : > { %p2421_p9 = pnand %p2875_p8, %p2419_p7 }
  0x1d   : > { %p2422_p10 = pneg %p2421_p9 }
  0x1f   : > { %p2427_p12 = pnand %p2425_p11, %p2422_p10 }
  0x21   : > { %2430 = shalt.err (!%p2427_p12)
}
  0x22   : > { %s2431_s13 = scalar_lea.vmem %s2848_s14, 3072  ;;  %p2439_p5 = scmp.lt.s32.totalorder %s2848_s14, %s2848_s14 }
  0x23   : > { %p2432_p13 = scmp.ne.s32.totalorder %s2848_s14, %s2431_s13  ;;  %p2440_p4 = scmp.lt.s32.totalorder %s2431_s13, %s2431_s13 }
  0x25   : > { %p2434_p0 = pnand %p2432_p13, %p2875_p8  ;;  %p2441_p7 = por %p2440_p4, %p2439_p5 }
  0x27   : > { %p2435_p2 = pneg %p2434_p0 }
  0x29   : > { %p2442_p9 = pnand %p2441_p7, %p2435_p2 }
  0x2b   : > { %2445 = shalt.err (!%p2442_p9)
}
  0x2c   : > { %s3294_s17 = smov 64   ;;  %s3295_s20 = smov 4  }
  0x2d   : > { %2242 = dma.hbm_to_vmem [thread:$0]  (!%p2859_p6), %s3302_s1, 3072, %s2848_s14, [#allocation6], %s3294_s17, %s3294_s17, %s3295_s20  }
  0x2e   : > { %s3304_s3 = sld [smem:[#allocation25_spill]] }
  0x34   : > { %s2446_s26 = scalar_lea.hbm %s3304_s3, 4096 }
  0x35   : > { %p2447_p4 = scmp.ne.s32.totalorder %s3304_s3, %s2446_s26  ;;  %p2453_p12 = scmp.lt.u32.totalorder %s2446_s26, %s3304_s3 }
  0x37   : > { %p2449_p10 = pnand %p2447_p4, %p2875_p8 }
  0x39   : > { %p2450_p11 = pneg %p2449_p10 }
  0x3b   : > { %p2455_p13 = pnand %p2453_p12, %p2450_p11 }
  0x3d   : > { %2458 = shalt.err (!%p2455_p13)
}
  0x3e   : > { %s2459_s14 = scalar_lea.vmem %s2863_s18, 4096  ;;  %p2467_p7 = scmp.lt.s32.totalorder %s2863_s18, %s2863_s18 }
  0x3f   : > { %p2460_p0 = scmp.ne.s32.totalorder %s2863_s18, %s2459_s14  ;;  %p2468_p9 = scmp.lt.s32.totalorder %s2459_s14, %s2459_s14 }
  0x41   : > { %p2462_p2 = pnand %p2460_p0, %p2875_p8  ;;  %p2469_p4 = por %p2468_p9, %p2467_p7 }
  0x43   : > { %p2463_p5 = pneg %p2462_p2 }
  0x45   : > { %p2470_p10 = pnand %p2469_p4, %p2463_p5 }
  0x47   : > { %2473 = shalt.err (!%p2470_p10)
}
  0x48   : > { %2248 = dma.hbm_to_vmem [thread:$0]  (!%p2859_p6), %s3304_s3, 4096, %s2863_s18, [#allocation9], %s3294_s17, %s3294_s17, %s3295_s20  }
  0x49   : > { %s2474_s25 = scalar_lea.hbm %s3286_s5, 2048 }
  0x4a   : > { %p2475_p11 = scmp.ne.s32.totalorder %s3286_s5, %s2474_s25  ;;  %p2481_p0 = scmp.lt.u32.totalorder %s2474_s25, %s3286_s5 }
  0x4c   : > { %p2477_p12 = pnand %p2475_p11, %p2875_p8 }
  0x4e   : > { %p2478_p13 = pneg %p2477_p12 }
  0x50   : > { %p2483_p2 = pnand %p2481_p0, %p2478_p13 }
  0x52   : > { %2486 = shalt.err (!%p2483_p2)
}
  0x53   : > { %s2487_s18 = scalar_lea.vmem %s2865_s21, 2048  ;;  %p2495_p4 = scmp.lt.s32.totalorder %s2865_s21, %s2865_s21 }
  0x54   : > { %p2488_p5 = scmp.ne.s32.totalorder %s2865_s21, %s2487_s18  ;;  %p2496_p10 = scmp.lt.s32.totalorder %s2487_s18, %s2487_s18 }
  0x56   : > { %p2490_p7 = pnand %p2488_p5, %p2875_p8  ;;  %p2497_p11 = por %p2496_p10, %p2495_p4 }
  0x58   : > { %p2491_p9 = pneg %p2490_p7 }
  0x5a   : > { %p2498_p12 = pnand %p2497_p11, %p2491_p9 }
  0x5c   : > { %2501 = shalt.err (!%p2498_p12)
}
  0x5d   : > { %2254 = dma.hbm_to_vmem [thread:$0]  (!%p2859_p6), %s3286_s5, 2048, %s2865_s21, [#allocation12], %s3294_s17, %s3294_s17, %s3295_s20  }
  0x5e   : > { %s2761_s22 = smov [#allocation14]   ;;  %s2762_s24 = smov [#allocation7]  }
  0x5f   : > { %s342_s23 = sshll.u32 %s2761_s22, 4  ;;  %s279_s25 = sshll.u32 %s2762_s24, 4  ;;  %s343_s23 = int_to_ptr.vmem [resolvable:$true] %s342_s23  ;;  %s280_s25 = int_to_ptr.vmem [resolvable:$true] %s279_s25 }
  0x60   : > { %s2502_s29 = scalar_lea.hbm %s3288_s7, 1024 }
  0x61   : > { %p2503_p13 = scmp.ne.s32.totalorder %s3288_s7, %s2502_s29  ;;  %p2509_p5 = scmp.lt.u32.totalorder %s2502_s29, %s3288_s7 }
  0x63   : > { %p2505_p0 = pnand %p2503_p13, %p2875_p8 }
  0x65   : > { %p2506_p2 = pneg %p2505_p0 }
  0x67   : > { %p2511_p7 = pnand %p2509_p5, %p2506_p2 }
  0x69   : > { %2514 = shalt.err (!%p2511_p7)
}
  0x6a   : > { %s2515_s21 = scalar_lea.vmem %s343_s23, 1024  ;;  %p2523_p11 = scmp.lt.s32.totalorder %s343_s23, %s343_s23 }
  0x6b   : > { %p2516_p9 = scmp.ne.s32.totalorder %s343_s23, %s2515_s21  ;;  %p2524_p12 = scmp.lt.s32.totalorder %s2515_s21, %s2515_s21 }
  0x6d   : > { %p2518_p4 = pnand %p2516_p9, %p2875_p8  ;;  %p2525_p1 = por %p2524_p12, %p2523_p11 }
  0x6f   : > { %p2519_p10 = pneg %p2518_p4 }
  0x71   : > { %p2526_p3 = pnand %p2525_p1, %p2519_p10 }
  0x73   : > { %2529 = shalt.err (!%p2526_p3)
}
  0x74   : > { %2260 = dma.hbm_to_vmem [thread:$0]  (!%p2859_p6), %s3288_s7, 1024, %s343_s23, [#allocation15], %s3294_s17, %s3294_s17, %s3295_s20  }
  0x75   : > { %s2530_s26 = scalar_lea.hbm %s3283_s2, 48 }
  0x76   : > { %p2531_p1 = scmp.ne.s32.totalorder %s3283_s2, %s2530_s26  ;;  %p2537_p0 = scmp.lt.u32.totalorder %s2530_s26, %s3283_s2 }
  0x78   : > { %p2533_p3 = pnand %p2531_p1, %p2875_p8 }
  0x7a   : > { %p2534_p13 = pneg %p2533_p3 }
  0x7c   : > { %p2539_p2 = pnand %p2537_p0, %p2534_p13 }
  0x7e   : > { %2542 = shalt.err (!%p2539_p2)
}
  0x7f   : > { %s2543_s14 = scalar_lea.vmem %s280_s25, 48  ;;  %s2550_s23 = scalar_lea.vmem %s280_s25, 64 }
  0x80   : > { %p2544_p5 = scmp.ne.s32.totalorder %s280_s25, %s2543_s14  ;;  %p2551_p4 = scmp.lt.s32.totalorder %s280_s25, %s280_s25 }
  0x81   : > { %p2552_p10 = scmp.lt.s32.totalorder %s2550_s23, %s2543_s14 }
  0x82   : > { %p2546_p7 = pnand %p2544_p5, %p2875_p8 }
  0x83   : > { %p2553_p11 = por %p2552_p10, %p2551_p4 }
  0x84   : > { %p2547_p9 = pneg %p2546_p7 }
  0x86   : > { %p2554_p12 = pnand %p2553_p11, %p2547_p9 }
  0x88   : > { %2557 = shalt.err (!%p2554_p12)
}
  0x89   : > { %s2763_s21 = smov 16   ;;  %s2764_s1 = smov 1  }
  0x8a   : > { %2245 = dma.hbm_to_vmem [thread:$0]  (!%p2859_p6), %s3283_s2, 48, %s280_s25, [#allocation6], %s2763_s21, %s2763_s21, %s2764_s1  }
  0x8b   : > { %s2765_s24 = smov [#allocation10]   ;;  %s2766_s28 = smov [#allocation13]  }
  0x8c   : > { %s306_s26 = sshll.u32 %s2765_s24, 4  ;;  %s329_s29 = sshll.u32 %s2766_s28, 4  ;;  %s307_s26 = int_to_ptr.vmem [resolvable:$true] %s306_s26  ;;  %s330_s29 = int_to_ptr.vmem [resolvable:$true] %s329_s29 }
  0x8d   : > { %s2558_s14 = scalar_lea.hbm %s3285_s4, 16 }
  0x8e   : > { %p2559_p1 = scmp.ne.s32.totalorder %s3285_s4, %s2558_s14  ;;  %p2565_p0 = scmp.lt.u32.totalorder %s2558_s14, %s3285_s4 }
  0x90   : > { %p2561_p3 = pnand %p2559_p1, %p2875_p8 }
  0x92   : > { %p2562_p13 = pneg %p2561_p3 }
  0x94   : > { %p2567_p2 = pnand %p2565_p0, %p2562_p13 }
  0x96   : > { %2570 = shalt.err (!%p2567_p2)
}
  0x97   : > { %s2571_s25 = scalar_lea.vmem %s307_s26, 16  ;;  %s2578_s9 = scalar_lea.vmem %s307_s26, 32 }
  0x98   : > { %p2572_p5 = scmp.ne.s32.totalorder %s307_s26, %s2571_s25  ;;  %p2579_p4 = scmp.lt.s32.totalorder %s307_s26, %s307_s26 }
  0x99   : > { %p2580_p10 = scmp.lt.s32.totalorder %s2578_s9, %s2571_s25 }
  0x9a   : > { %p2574_p7 = pnand %p2572_p5, %p2875_p8 }
  0x9b   : > { %p2581_p11 = por %p2580_p10, %p2579_p4 }
  0x9c   : > { %p2575_p9 = pneg %p2574_p7 }
  0x9e   : > { %p2582_p12 = pnand %p2581_p11, %p2575_p9 }
  0xa0   : > { %2585 = shalt.err (!%p2582_p12)
}
  0xa1   : > { %2251 = dma.hbm_to_vmem [thread:$0]  (!%p2859_p6), %s3285_s4, 16, %s307_s26, [#allocation9]  }
  0xa2   : > { %s2586_s24 = scalar_lea.hbm %s3287_s6, 32 }
  0xa3   : > { %p2587_p1 = scmp.ne.s32.totalorder %s3287_s6, %s2586_s24  ;;  %p2593_p0 = scmp.lt.u32.totalorder %s2586_s24, %s3287_s6 }
  0xa5   : > { %p2589_p3 = pnand %p2587_p1, %p2875_p8 }
  0xa7   : > { %p2590_p13 = pneg %p2589_p3 }
  0xa9   : > { %p2595_p2 = pnand %p2593_p0, %p2590_p13 }
  0xab   : > { %2598 = shalt.err (!%p2595_p2)
}
  0xac   : > { %s2599_s23 = scalar_lea.vmem %s330_s29, 32  ;;  %p2607_p4 = scmp.lt.s32.totalorder %s330_s29, %s330_s29 }
  0xad   : > { %p2600_p5 = scmp.ne.s32.totalorder %s330_s29, %s2599_s23  ;;  %p2608_p10 = scmp.lt.s32.totalorder %s2599_s23, %s2599_s23 }
  0xaf   : > { %p2602_p7 = pnand %p2600_p5, %p2875_p8  ;;  %p2609_p11 = por %p2608_p10, %p2607_p4 }
  0xb1   : > { %p2603_p9 = pneg %p2602_p7 }
  0xb3   : > { %p2610_p12 = pnand %p2609_p11, %p2603_p9 }
  0xb5   : > { %2613 = shalt.err (!%p2610_p12)
}
  0xb6   : > { %2257 = dma.hbm_to_vmem [thread:$0]  (!%p2859_p6), %s3287_s6, 32, %s330_s29, [#allocation12], %s2763_s21, %s2763_s21, %s2764_s1  }
  0xb7   : > { %s2767_s9 = smov [#allocation16]   ;;  %s2614_s20 = scalar_lea.hbm %s3289_s8, 16 }
  0xb8   : > { %s356_s17 = sshll.u32 %s2767_s9, 4  ;;  %p2615_p1 = scmp.ne.s32.totalorder %s3289_s8, %s2614_s20  ;;  %s357_s17 = int_to_ptr.vmem [resolvable:$true] %s356_s17 }
  0xb9   : > { %p2621_p0 = scmp.lt.u32.totalorder %s2614_s20, %s3289_s8 }
  0xba   : > { %p2617_p3 = pnand %p2615_p1, %p2875_p8 }
  0xbc   : > { %p2618_p13 = pneg %p2617_p3 }
  0xbe   : > { %p2623_p2 = pnand %p2621_p0, %p2618_p13 }
  0xc0   : > { %2626 = shalt.err (!%p2623_p2)
}
  0xc1   : > { %s2627_s21 = scalar_lea.vmem %s357_s17, 16  ;;  %s2634_s1 = scalar_lea.vmem %s357_s17, 32 }
  0xc2   : > { %p2628_p5 = scmp.ne.s32.totalorder %s357_s17, %s2627_s21  ;;  %p2635_p4 = scmp.lt.s32.totalorder %s357_s17, %s357_s17 }
  0xc3   : > { %p2636_p10 = scmp.lt.s32.totalorder %s2634_s1, %s2627_s21 }
  0xc4   : > { %p2630_p7 = pnand %p2628_p5, %p2875_p8 }
  0xc5   : > { %p2637_p11 = por %p2636_p10, %p2635_p4 }
  0xc6   : > { %p2631_p9 = pneg %p2630_p7 }
  0xc8   : > { %p2638_p12 = pnand %p2637_p11, %p2631_p9 }
  0xca   : > { %2641 = shalt.err (!%p2638_p12)
}
  0xcb   : > { %2263 = dma.hbm_to_vmem [thread:$0]  (!%p2859_p6), %s3289_s8, 16, %s357_s17, [#allocation15]  }
  0xcc   : > { %s1791_s27 = sadd.s32 4294967294, %s2754_s12   ;;  %s3052_s19 = sadd.s32 1, %s2754_s12  }
  0xcd   : > { %s33_s23 = ssub.s32 %s2754_s12, %s3052_s19  ;;  %s36_s26 = sadd.s32 1, %s2750_s11 }
  0xce   : > { %p34_p8 = scmp.eq.s32.totalorder %s33_s23, 0  ;;  %p43_p1 = scmp.ne.s32.totalorder %s2750_s11, %s2746_s10 }
  0xcf   : > { %p44_p3 = scmp.eq.s32.totalorder %s2754_s12, 0  ;;  %p49_p13 = scmp.ne.s32.totalorder %s2746_s10, %s2742_s30 }
  0xd0   : > { %s3063_s25 = scalar_select %p34_p8, %s2750_s11, %s36_s26  }
  0xd1   : > { %p3065_p0 = por %p44_p3, %p43_p1  ;;  %p3306_p2 = scmp.eq.s32.totalorder %s2843_s15, 0 }
  0xd2   : > { %p241_p5 = scmp.eq.s32.totalorder %s2843_s15, 1  ;;  %p247_p7 = scmp.eq.s32.totalorder %s1791_s27, 1 }
  0xd3   : > { %p3071_p6 = por %p3306_p2, %p49_p13  ;;  %p2280_p9 = scmp.lt.s32.totalorder %s2754_s12, 2 }
  0xd4   : > { %s367_s22 = sand.u32 1, %s2750_s11   ;;  %p3078_p4 = por %p241_p5, %p43_p1 }
  0xd5   : > { %p3082_p10 = por %p247_p7, %p49_p13  ;;  %s1802_s24 = sshll.u32 %s367_s22, 4 }
  0xd6   : > { %s3308_s3 = scalar_select %p3078_p4, 1, 0 }
  0xd7   : > { %s3309_s20 = scalar_select %p3082_p10, 1, 0 }
  0xd8   : > { %s1909_s28 = sshll.u32 %s2754_s12, 8  ;;  %s371_s1 = scalar_lea.vmem [#allocation2], %s1802_s24 }
  0xd9   : > { %s3090_s21 = scalar_lea.hbm %s3281_s0, %s1909_s28  ;;  %s378_s29 = sshll.u32 %s371_s1, 4  ;;  %s3092_s29 = int_to_ptr.vmem [resolvable:$true] %s378_s29 }
  0xda   : > { %p3096_p11 = pnand %p2280_p9, %p3065_p0  ;;  %s3100_s27 = scalar_lea.sflag [#allocation3], %s367_s22 }
  0xdb   : > { %s2642_s23 = scalar_lea.hbm %s3090_s21, 256  ;;  %s2647_s9 = scalar_lea.hbm %s3281_s0, 512 }
  0xdc   : > { %p2643_p12 = scmp.ne.s32.totalorder %s3090_s21, %s2642_s23  ;;  %p2644_p8 = pneg %p3096_p11 }
  0xdd   : > { %p2648_p13 = scmp.lt.u32.totalorder %s3090_s21, %s3281_s0  ;;  %p2649_p0 = scmp.lt.u32.totalorder %s2647_s9, %s2642_s23 }
  0xde   : > { %p2645_p1 = pnand %p2644_p8, %p2643_p12  ;;  %p2651_p5 = scmp.lt.u32.totalorder %s2642_s23, %s3090_s21 }
  0xdf   : > { %p2650_p2 = por %p2649_p0, %p2648_p13 }
  0xe0   : > { %p2646_p3 = pneg %p2645_p1 }
  0xe1   : > { %p2652_p7 = por %p2651_p5, %p2650_p2 }
  0xe3   : > { %p2653_p9 = pnand %p2652_p7, %p2646_p3 }
  0xe5   : > { %2656 = shalt.err (!%p2653_p9)
}
  0xe6   : > { %s2657_s22 = scalar_lea.vmem %s3092_s29, 256  ;;  %s2768_s18 = smov [#allocation2]  }
  0xe7   : > { %p2658_p12 = scmp.ne.s32.totalorder %s3092_s29, %s2657_s22  ;;  %s2662_s1 = sshll.u32 %s2768_s18, 4  ;;  %s2663_s1 = int_to_ptr.vmem [resolvable:$false] %s2662_s1 }
  0xe8   : > { %s2664_s26 = scalar_lea.vmem %s2663_s1, 512  ;;  %p2665_p4 = scmp.lt.s32.totalorder %s3092_s29, %s2663_s1 }
  0xe9   : > { %p2660_p1 = pnand %p2658_p12, %p2644_p8  ;;  %p2666_p13 = scmp.lt.s32.totalorder %s2664_s26, %s2657_s22 }
  0xeb   : > { %p2661_p10 = pneg %p2660_p1  ;;  %p2667_p0 = por %p2666_p13, %p2665_p4 }
  0xed   : > { %p2668_p2 = pnand %p2667_p0, %p2661_p10 }
  0xef   : > { %2671 = shalt.err (!%p2668_p2)
}
  0xf0   : > { %s3311_s23 = smov 4   ;;  %s3312_s24 = smov 64  }
  0xf1   : > { %2267 = dma.hbm_to_vmem [thread:$0]  (!%p3096_p11), %s3090_s21, 256, %s3092_s29, %s3100_s27, %s3312_s24, %s3312_s24, %s3311_s23  }
  0xf2   : > { %p3313_p8 = scmp.ne.s32.totalorder %s3300_s16, 0 }
  0xf3   : > { %s3134_s9 = sand.u32 (!%p3313_p8), 1, %s2746_s10  }
  0xf4   : > { %390 = sbr.rel (%p3313_p8) target bundleno = 1883 (0x75b), region = 56  ;;  %s1806_s28 = sshll.u32 (!%p3313_p8), %s3134_s9, 4 }
  0xf5   : > { %s393_s13 = scalar_lea.sflag (!%p3313_p8), [#allocation3], %s3134_s9  ;;  %s3138_s22 = scalar_lea.vmem (!%p3313_p8), [#allocation2], %s1806_s28 }
  0xfb   : > { %2717 = dma.done.wait (%p3071_p6), %s393_s13, 256  }
  0xfc   : > { %2719 = vsyncadd (%p3071_p6), %s393_s13, 4294967040  ;;  %p3314_p4 = scmp.eq.s32.totalorder %s2843_s15, 0 }
  0xfe   : > { %2721 = dma.done.wait (%p3314_p4), [#allocation6], 3120   ;;  %p3315_p10 = pmov %p3314_p4 }
  0xff   : > { %p3316_p11 = pmov %p3314_p4 }
 0x100   : > { %2723 = vsyncadd (%p3315_p10), [#allocation6], 4294964176 }
 0x101   : > { %2725 = dma.done.wait (%p3316_p11), [#allocation9], 4112   ;;  %p3317_p3 = pmov %p3314_p4 }
 0x103   : > { %2727 = vsyncadd (%p3317_p3), [#allocation9], 4294963184  ;;  %p3318_p5 = pmov %p3317_p3 }
 0x104   : > { %p3319_p7 = pmov %p3317_p3 }
 0x105   : > { %2729 = dma.done.wait (%p3318_p5), [#allocation12], 2080  }
 0x106   : > { %2731 = vsyncadd (%p3319_p7), [#allocation12], 4294965216  ;;  %p3320_p6 = pmov %p3317_p3 }
 0x107   : > { %p3321_p9 = pmov %p3317_p3 }
 0x108   : > { %2733 = dma.done.wait (%p3320_p6), [#allocation15], 1040  }
 0x109   : > { %2735 = vsyncadd (%p3321_p9), [#allocation15], 4294966256  ;;  %v2336_v0 = vld [vmem:[#allocation5] sm:$0xff]   ;;  %v2337_v1 = vld [vmem:[#allocation5 + $0x8] sm:$0xff]   ;;  %v2769_v41 = vmov 0.0   ;;  %vm2770_vm0 = vmmov 0  }
 0x10a   : > { %2003 = vmatprep.subr.bf16.mxu0 %v2336_v0  ;;  %v2338_v2 = vld [vmem:[#allocation5 + $0x10] sm:$0xff]   ;;  %v2339_v3 = vld [vmem:[#allocation5 + $0x18] sm:$0xff]   ;;  %v2346_v5 = vld [vmem:[#allocation5 + $0x40] sm:$0xff]   ;;  %s1815_s16 = sshll.u32 %s3134_s9, 3  ;;  %s1906_s17 = sshll.u32 %s2843_s15, 7 }
 0x10b   : > { %2004 = vmatpush3.bf16.msra.mxu0 %v2336_v0  ;;  %v2344_v4 = vld [vmem:[%s3138_s22] sm:$0xff]   ;;  %v2347_v6 = vld [vmem:[#allocation5 + $0x48] sm:$0xff]   ;;  %2023 = vmatprep.subr.bf16.mxu1 %v2346_v5  ;;  %v2349_v10 = vld [vmem:[#allocation5 + $0x58] sm:$0xff]   ;;  %s462_s21 = scalar_lea.vmem [#allocation17], %s1815_s16  ;;  %s3322_s18 = sld [smem:[#allocation26_spill]] }
 0x10c   : > { %2005 = vmatprep.subr.bf16.mxu0 %v2337_v1  ;;  %2019 = vmatprep.mubr.bf16.mxu0 %v2344_v4  ;;  %v2340_v7 = vld [vmem:[#allocation5 + $0x20] sm:$0xff]   ;;  %v2348_v8 = vld [vmem:[#allocation5 + $0x50] sm:$0xff]   ;;  %v2341_v9 = vld [vmem:[#allocation5 + $0x28] sm:$0xff]   ;;  %s1645_s29 = sshll.u32 %s462_s21, 4  ;;  %s1632_s26 = scalar_lea.sflag [#allocation4], %s3134_s9  ;;  %s3239_s29 = int_to_ptr.vmem [resolvable:$true] %s1645_s29 }
 0x10d   : > { %2024 = vmatpush3.bf16.msra.mxu1 %v2346_v5  ;;  %v2342_v11 = vld [vmem:[#allocation5 + $0x30] sm:$0xff]   ;;  %v2350_v12 = vld [vmem:[#allocation5 + $0x60] sm:$0xff]   ;;  %v2343_v13 = vld [vmem:[#allocation5 + $0x38] sm:$0xff]   ;;  %s2672_s15 = scalar_lea.vmem %s3239_s29, 128  ;;  %p3323_p1 = scmp.ne.s32.totalorder %s3308_s3, 0 }
 0x10e   : > { %2025 = vmatprep.subr.bf16.mxu1 %v2347_v6  ;;  %v2351_v14 = vld [vmem:[#allocation5 + $0x68] sm:$0xff]   ;;  %v2352_v16 = vld [vmem:[#allocation5 + $0x70] sm:$0xff]   ;;  %v2353_v17 = vld [vmem:[#allocation5 + $0x78] sm:$0xff]   ;;  %p2673_p12 = scmp.ne.s32.totalorder %s3239_s29, %s2672_s15  ;;  %s2771_s23 = smov [#allocation17]  }
 0x10f   : > { %2006 = vmatpush3.bf16.msra.mxu0 %v2337_v1  ;;  %v2345_v15 = vld [vmem:[%s3138_s22 + $0x8] sm:$0xff]   ;;  %v2354_v18 = vld [vmem:[#allocation5 + $0x80] sm:$0xff]   ;;  %v2356_v20 = vld [vmem:[#allocation5 + $0x90] sm:$0xff]   ;;  %s2676_s24 = sshll.u32 %s2771_s23, 4  ;;  %s2677_s24 = int_to_ptr.vmem [resolvable:$false] %s2676_s24 }
 0x110   : > { %2007 = vmatprep.subr.bf16.mxu0 %v2338_v2  ;;  %v2355_v19 = vld [vmem:[#allocation5 + $0x88] sm:$0xff]   ;;  %v2357_v21 = vld [vmem:[#allocation5 + $0x98] sm:$0xff]   ;;  %v2358_v22 = vld [vmem:[#allocation5 + $0xa0] sm:$0xff]   ;;  %p2674_p13 = pnand %p2673_p12, %p3323_p1  ;;  %s2678_s28 = scalar_lea.vmem %s2677_s24, 256 }
 0x111   : > { %2026 = vmatpush3.bf16.msra.mxu1 %v2347_v6  ;;  %v2359_v23 = vld [vmem:[#allocation5 + $0xa8] sm:$0xff]   ;;  %v1816_v24 = vld [vmem:[#allocation7] ss:$0 sm:$0xff]  ;;  %v2360_v39 = vld [vmem:[#allocation5 + $0xb0] sm:$0xff]   ;;  %s3237_s1 = scalar_lea.hbm %s3322_s18, %s1906_s17  ;;  %p2679_p2 = scmp.lt.s32.totalorder %s3239_s29, %s2677_s24 }
 0x112   : > { %2027 = vmatprep.subr.bf16.mxu1 %v2348_v8  ;;  %v2361_v40 = vld [vmem:[#allocation5 + $0xb8] sm:$0xff]   ;;  %v2363_v42 = vld [vmem:[#allocation8 + $0x40] sm:$0xff]   ;;  %v2365_v43 = vld [vmem:[#allocation8 + $0x48] sm:$0xff]   ;;  %p2675_p0 = pneg %p2674_p13  ;;  %p2680_p8 = scmp.lt.s32.totalorder %s2678_s28, %s2672_s15 }
 0x113   : > { %2008 = vmatpush3.bf16.msra.mxu0 %v2338_v2  ;;  %v2367_v44 = vld [vmem:[#allocation8 + $0x50] sm:$0xff]   ;;  %v2369_v45 = vld [vmem:[#allocation8 + $0x58] sm:$0xff]   ;;  %v2371_v46 = vld [vmem:[#allocation8 + $0x60] sm:$0xff]  }
 0x114   : > { %2009 = vmatprep.subr.bf16.mxu0 %v2339_v3  ;;  %v1827_v47 = vld [vmem:[#allocation7 + $0x1] ss:$0 sm:$0xff]  ;;  %v2362_v62 = vld [vmem:[#allocation8] sm:$0xff]   ;;  %v2364_v63 = vld [vmem:[#allocation8 + $0x8] sm:$0xff]   ;;  %p2681_p4 = por %p2680_p8, %p2679_p2 }
 0x115   : > { %2028 = vmatpush3.bf16.msra.mxu1 %v2348_v8  ;;  %v2366_v0 = vld [vmem:[#allocation8 + $0x10] sm:$0xff]   ;;  %v2368_v1 = vld [vmem:[#allocation8 + $0x18] sm:$0xff]   ;;  %v2370_v2 = vld [vmem:[#allocation8 + $0x20] sm:$0xff]  }
 0x116   : > { %2029 = vmatprep.subr.bf16.mxu1 %v2349_v10  ;;  %v2373_v4 = vld [vmem:[#allocation8 + $0x68] sm:$0xff]   ;;  %v2374_v5 = vld [vmem:[#allocation8 + $0x30] sm:$0xff]   ;;  %v2377_v8 = vld [vmem:[#allocation8 + $0x78] sm:$0xff]   ;;  %p2682_p10 = pnand %p2681_p4, %p2675_p0 }
 0x117   : > { %2010 = vmatpush3.bf16.msra.mxu0 %v2339_v3  ;;  %v2372_v3 = vld [vmem:[#allocation8 + $0x28] sm:$0xff]   ;;  %v2375_v6 = vld [vmem:[#allocation8 + $0x70] sm:$0xff]  }
 0x118   : > { %2011 = vmatprep.subr.bf16.mxu0 %v2340_v7 }
 0x119   : > { %2030 = vmatpush3.bf16.msra.mxu1 %v2349_v10 }
 0x11a   : > { %2031 = vmatprep.subr.bf16.mxu1 %v2350_v12 }
 0x11b   : > { %2012 = vmatpush3.bf16.msra.mxu0 %v2340_v7  ;;  %v2376_v7 = vld [vmem:[#allocation8 + $0x38] sm:$0xff]  }
 0x11c   : > { %2013 = vmatprep.subr.bf16.mxu0 %v2341_v9 }
 0x11d   : > { %2032 = vmatpush3.bf16.msra.mxu1 %v2350_v12 }
 0x11e   : > { %2033 = vmatprep.subr.bf16.mxu1 %v2351_v14 }
 0x11f   : > { %2014 = vmatpush3.bf16.msra.mxu0 %v2341_v9  ;;  %v1836_v9 = vld [vmem:[#allocation7 + $0x2] ss:$0 sm:$0xff] }
 0x120   : > { %2015 = vmatprep.subr.bf16.mxu0 %v2342_v11 }
 0x121   : > { %2034 = vmatpush3.bf16.msra.mxu1 %v2351_v14 }
 0x122   : > { %2035 = vmatprep.subr.bf16.mxu1 %v2352_v16 }
 0x123   : > { %2016 = vmatpush3.bf16.msra.mxu0 %v2342_v11 }
 0x124   : > { %2017 = vmatprep.subr.bf16.mxu0 %v2343_v13 }
 0x125   : > { %2036 = vmatpush3.bf16.msra.mxu1 %v2352_v16 }
 0x126   : > { %2037 = vmatprep.subr.bf16.mxu1 %v2353_v17 }
 0x127   : > { %2018 = vmatpush3.bf16.msra.mxu0 %v2343_v13 }
 0x128   : > { %2043 = vmatprep.subr.bf16.mxu0 %v2354_v18 }
 0x129   : > { %2038 = vmatpush3.bf16.msra.mxu1 %v2353_v17 }
 0x12a   : > { %2020 = vmatmul.mubr.bf16.vlgmr.msra.gmra.mrb[0].mxu0 %v2345_v15  ;;  %2063 = vmatprep.subr.bf16.mxu1 %v2769_v41 }
 0x12b   : > { %2044 = vmatpush3.bf16.msra.mxu0 %v2354_v18 }
 0x12c   : > { %2045 = vmatprep.subr.bf16.mxu0 %v2355_v19 }
 0x12f   : > { %2046 = vmatpush3.bf16.msra.mxu0 %v2355_v19 }
 0x130   : > { %2047 = vmatprep.subr.bf16.mxu0 %v2356_v20 }
 0x133   : > { %2048 = vmatpush3.bf16.msra.mxu0 %v2356_v20 }
 0x134   : > { %2049 = vmatprep.subr.bf16.mxu0 %v2357_v21 }
 0x137   : > { %2050 = vmatpush3.bf16.msra.mxu0 %v2357_v21 }
 0x138   : > { %2051 = vmatprep.subr.bf16.mxu0 %v2358_v22 }
 0x13b   : > { %2052 = vmatpush3.bf16.msra.mxu0 %v2358_v22 }
 0x13c   : > { %2053 = vmatprep.subr.bf16.mxu0 %v2359_v23 }
 0x13f   : > { %2054 = vmatpush3.bf16.msra.mxu0 %v2359_v23  ;;  %v2378_v23 = vld [vmem:[#allocation8 + $0xc0] sm:$0xff]  }
 0x140   : > { %2055 = vmatprep.subr.bf16.mxu0 %v2360_v39 }
 0x143   : > { %2056 = vmatpush3.bf16.msra.mxu0 %v2360_v39  ;;  %v2392_v39 = vld [vmem:[#allocation8 + $0xf8] sm:$0xff]  }
 0x144   : > { %2057 = vmatprep.subr.bf16.mxu0 %v2361_v40 }
 0x147   : > { %2058 = vmatpush3.bf16.msra.mxu0 %v2361_v40  ;;  %v2393_v40 = vld [vmem:[#allocation8 + $0xb8] sm:$0xff]  }
 0x148   : > { %2083 = vmatprep.subr.bf16.mxu0 %v2769_v41 }
 0x1fd   : > { %v2021_v25 = vpop.f32.mrb[0].mxu0 }
 0x1fe   : > { %v745_v26 = vadd.f32 %v2021_v25, %v1816_v24  ;;  %v736_v27 = vpop.f32.mrb[1].mxu0  ;;  %v2379_v25 = vld [vmem:[#allocation8 + $0x80] sm:$0xff]  }
 0x1ff   : > { %v737_v28 = vadd.f32 %v1816_v24, %v736_v27  ;;  %v2022_v29 = vpop.f32.mrb[2].mxu0  ;;  %v2380_v27 = vld [vmem:[#allocation8 + $0xc8] sm:$0xff]  }
 0x200   : > { %v748_v30 = vadd.f32 %v2022_v29, %v1816_v24  ;;  %v739_v31 = vpop.f32.mrb[3].mxu0  ;;  %v753_v33 = vmax.f32 %v745_v26, 0.0  ;;  %v2382_v29 = vld [vmem:[#allocation8 + $0xd0] sm:$0xff]  }
 0x201   : > { %v740_v32 = vadd.f32 %v1816_v24, %v739_v31  ;;  %v751_v35 = vmax.f32 %v737_v28, 0.0  ;;  %v2381_v28 = vld [vmem:[#allocation8 + $0x88] sm:$0xff]   ;;  %v2384_v31 = vld [vmem:[#allocation8 + $0xd8] sm:$0xff]  }
 0x202   : > { %v754_v34 = vmax.f32 %v748_v30, 0.0  ;;  %v2383_v30 = vld [vmem:[#allocation8 + $0x90] sm:$0xff]  }
 0x203   : > { %v752_v36 = vmax.f32 %v740_v32, 0.0  ;;  %v2385_v32 = vld [vmem:[#allocation8 + $0x98] sm:$0xff]  }
 0x204   : > { %v756_v37 = vpack.c.bf16 %v754_v34, %v753_v33  ;;  %v2386_v33 = vld [vmem:[#allocation8 + $0xe0] sm:$0xff]  }
 0x205   : > { %v755_v38 = vpack.c.bf16 %v752_v36, %v751_v35  ;;  %v2387_v34 = vld [vmem:[#allocation8 + $0xa0] sm:$0xff]   ;;  %v2388_v35 = vld [vmem:[#allocation8 + $0xe8] sm:$0xff]  }
 0x206   : > { %v2389_v36 = vld [vmem:[#allocation8 + $0xa8] sm:$0xff]  }
 0x207   : > { %2039 = vmatprep.mubr.bf16.mxu1 %v755_v38  ;;  %v2391_v38 = vld [vmem:[#allocation8 + $0xb0] sm:$0xff]  }
 0x208   : > { %2040 = vmatmul.mubr.bf16.vlgmr.msra.gmra.mrb[0].mxu1 %v756_v37  ;;  %v2390_v37 = vld [vmem:[#allocation8 + $0xf0] sm:$0xff]  }
 0x209   : > { %2064 = vmatpush3.bf16.msra.mxu1 %v2363_v42  ;;  %2079 = vmatprep.mubr.msk.bf16.mxu1 %vm2770_vm0, %v2769_v41 }
 0x20a   : > { %2065 = vmatprep.subr.bf16.mxu1 %v2769_v41 }
 0x20d   : > { %2066 = vmatpush3.bf16.msra.mxu1 %v2365_v43  ;;  %v2394_v43 = vld [vmem:[#allocation11] sm:$0xff]  }
 0x20e   : > { %2067 = vmatprep.subr.bf16.mxu1 %v2769_v41 }
 0x211   : > { %2068 = vmatpush3.bf16.msra.mxu1 %v2367_v44  ;;  %v2395_v44 = vld [vmem:[#allocation11 + $0x8] sm:$0xff]  }
 0x212   : > { %2069 = vmatprep.subr.bf16.mxu1 %v2769_v41 }
 0x215   : > { %2070 = vmatpush3.bf16.msra.mxu1 %v2369_v45  ;;  %v2396_v45 = vld [vmem:[#allocation11 + $0x10] sm:$0xff]  }
 0x216   : > { %2071 = vmatprep.subr.bf16.mxu1 %v2769_v41 }
 0x219   : > { %2072 = vmatpush3.bf16.msra.mxu1 %v2371_v46  ;;  %v2397_v46 = vld [vmem:[#allocation11 + $0x18] sm:$0xff]  }
 0x21a   : > { %2073 = vmatprep.subr.bf16.mxu1 %v2769_v41 }
 0x21d   : > { %2074 = vmatpush3.bf16.msra.mxu1 %v2373_v4 }
 0x21e   : > { %2075 = vmatprep.subr.bf16.mxu1 %v2769_v41 }
 0x221   : > { %2076 = vmatpush3.bf16.msra.mxu1 %v2375_v6 }
 0x222   : > { %2077 = vmatprep.subr.bf16.mxu1 %v2769_v41 }
 0x225   : > { %2078 = vmatpush3.bf16.msra.mxu1 %v2377_v8 }
 0x226   : > { %2103 = vmatprep.subr.bf16.mxu1 %v2769_v41 }
 0x2db   : > { %v2041_v48 = vpop.f32.mrb[0].mxu1 }
 0x2dc   : > { %v854_v49 = vadd.f32 %v2041_v48, %v1827_v47  ;;  %v845_v50 = vpop.f32.mrb[1].mxu1  ;;  %v2399_v48 = vld [vmem:[#allocation11 + $0x28] sm:$0xff]  }
 0x2dd   : > { %v846_v51 = vadd.f32 %v1827_v47, %v845_v50  ;;  %v2042_v52 = vpop.f32.mrb[2].mxu1  ;;  %v2401_v50 = vld [vmem:[#allocation11 + $0x38] sm:$0xff]  }
 0x2de   : > { %v857_v53 = vadd.f32 %v2042_v52, %v1827_v47  ;;  %v848_v54 = vpop.f32.mrb[3].mxu1  ;;  %v862_v56 = vmax.f32 %v854_v49, 0.0  ;;  %v2400_v49 = vld [vmem:[#allocation11 + $0x30] sm:$0xff]   ;;  %v2403_v52 = vld [vmem:[#allocation11 + $0x48] sm:$0xff]  }
 0x2df   : > { %v849_v55 = vadd.f32 %v1827_v47, %v848_v54  ;;  %v860_v58 = vmax.f32 %v846_v51, 0.0  ;;  %v2398_v47 = vld [vmem:[#allocation11 + $0x20] sm:$0xff]   ;;  %v2405_v54 = vld [vmem:[#allocation11 + $0x58] sm:$0xff]  }
 0x2e0   : > { %v863_v57 = vmax.f32 %v857_v53, 0.0  ;;  %v2402_v51 = vld [vmem:[#allocation11 + $0x40] sm:$0xff]   ;;  %v2404_v53 = vld [vmem:[#allocation11 + $0x50] sm:$0xff]  }
 0x2e1   : > { %v861_v59 = vmax.f32 %v849_v55, 0.0  ;;  %v2406_v55 = vld [vmem:[#allocation11 + $0x60] sm:$0xff]  }
 0x2e2   : > { %v865_v60 = vpack.c.bf16 %v863_v57, %v862_v56  ;;  %v2407_v56 = vld [vmem:[#allocation11 + $0x68] sm:$0xff]  }
 0x2e3   : > { %v864_v61 = vpack.c.bf16 %v861_v59, %v860_v58 }
 0x2e5   : > { %2059 = vmatprep.mubr.bf16.mxu0 %v864_v61 }
 0x2e6   : > { %2060 = vmatmul.mubr.bf16.vlgmr.msra.gmra.mrb[4].mxu0 %v865_v60 }
 0x2e7   : > { %2084 = vmatpush3.bf16.msra.mxu0 %v2362_v62  ;;  %2099 = vmatprep.mubr.msk.bf16.mxu0 %vm2770_vm0, %v2769_v41 }
 0x2e8   : > { %2085 = vmatprep.subr.bf16.mxu0 %v2769_v41 }
 0x2eb   : > { %2086 = vmatpush3.bf16.msra.mxu0 %v2364_v63 }
 0x2ec   : > { %2087 = vmatprep.subr.bf16.mxu0 %v2769_v41 }
 0x2ef   : > { %2088 = vmatpush3.bf16.msra.mxu0 %v2366_v0 }
 0x2f0   : > { %2089 = vmatprep.subr.bf16.mxu0 %v2769_v41 }
 0x2f3   : > { %2090 = vmatpush3.bf16.msra.mxu0 %v2368_v1 }
 0x2f4   : > { %2091 = vmatprep.subr.bf16.mxu0 %v2769_v41 }
 0x2f7   : > { %2092 = vmatpush3.bf16.msra.mxu0 %v2370_v2 }
 0x2f8   : > { %2093 = vmatprep.subr.bf16.mxu0 %v2769_v41 }
 0x2fb   : > { %2094 = vmatpush3.bf16.msra.mxu0 %v2372_v3 }
 0x2fc   : > { %2095 = vmatprep.subr.bf16.mxu0 %v2769_v41 }
 0x2ff   : > { %2096 = vmatpush3.bf16.msra.mxu0 %v2374_v5 }
 0x300   : > { %2097 = vmatprep.subr.bf16.mxu0 %v2769_v41 }
 0x303   : > { %2098 = vmatpush3.bf16.msra.mxu0 %v2376_v7 }
 0x304   : > { %2123 = vmatprep.subr.bf16.mxu0 %v2769_v41 }
 0x3b9   : > { %v2061_v10 = vpop.f32.mrb[4].mxu0 }
 0x3ba   : > { %v963_v11 = vadd.f32 %v2061_v10, %v1836_v9  ;;  %v954_v12 = vpop.f32.mrb[5].mxu0 }
 0x3bb   : > { %v955_v13 = vadd.f32 %v1836_v9, %v954_v12  ;;  %v2062_v14 = vpop.f32.mrb[6].mxu0 }
 0x3bc   : > { %v966_v15 = vadd.f32 %v2062_v14, %v1836_v9  ;;  %v957_v16 = vpop.f32.mrb[7].mxu0  ;;  %v971_v18 = vmax.f32 %v963_v11, 0.0 }
 0x3bd   : > { %v958_v17 = vadd.f32 %v1836_v9, %v957_v16  ;;  %v969_v20 = vmax.f32 %v955_v13, 0.0  ;;  %v1877_v9 = vld [vmem:[#allocation10] ss:$0 sm:$0xff]  ;;  %v2408_v16 = vld [vmem:[#allocation11 + $0x70] sm:$0xff]  }
 0x3be   : > { %v972_v19 = vmax.f32 %v966_v15, 0.0 }
 0x3bf   : > { %v970_v21 = vmax.f32 %v958_v17, 0.0  ;;  %v2409_v17 = vld [vmem:[#allocation11 + $0x78] sm:$0xff]  }
 0x3c0   : > { %v974_v22 = vpack.c.bf16 %v972_v19, %v971_v18  ;;  %v2410_v18 = vld [vmem:[#allocation14] sm:$0xff]   ;;  %v2411_v19 = vld [vmem:[#allocation14 + $0x8] sm:$0xff]  }
 0x3c1   : > { %v973_v24 = vpack.c.bf16 %v970_v21, %v969_v20  ;;  %v2412_v20 = vld [vmem:[#allocation14 + $0x10] sm:$0xff]   ;;  %v2413_v21 = vld [vmem:[#allocation14 + $0x18] sm:$0xff]  }
 0x3c2   : > { %v1244_v42 = vrot.slane %v974_v22, 4 }
 0x3c3   : > { %v976_v26 = vrot.slane %v973_v24, 4  ;;  %2100 = vmatmul.mubr.bf16.vlgmr.msra.gmra.mrb[8].mxu0 %v973_v24  ;;  %v1878_v24 = vld [vmem:[#allocation13] ss:$0 sm:$0xff] }
 0x3c4   : > { %2124 = vmatpush3.bf16.msra.mxu0 %v2378_v23  ;;  %2139 = vmatprep.mubr.msk.bf16.mxu0 %vm2770_vm0, %v2769_v41  ;;  %v2415_v23 = vld [vmem:[#allocation14 + $0x28] sm:$0xff]  }
 0x3c5   : > { %2080 = vmatmul.mubr.bf16.vlgmr.msra.gmra.mrb[4].mxu1 %v976_v26  ;;  %2125 = vmatprep.subr.bf16.mxu0 %v2769_v41 }
 0x3c6   : > { %2104 = vmatpush3.bf16.msra.mxu1 %v2379_v25  ;;  %2119 = vmatprep.mubr.msk.bf16.mxu1 %vm2770_vm0, %v2769_v41 }
 0x3c7   : > { %2105 = vmatprep.subr.bf16.mxu1 %v2769_v41 }
 0x3c8   : > { %2126 = vmatpush3.bf16.msra.mxu0 %v2380_v27 }
 0x3c9   : > { %2127 = vmatprep.subr.bf16.mxu0 %v2769_v41 }
 0x3ca   : > { %2106 = vmatpush3.bf16.msra.mxu1 %v2381_v28 }
 0x3cb   : > { %2107 = vmatprep.subr.bf16.mxu1 %v2769_v41 }
 0x3cc   : > { %2128 = vmatpush3.bf16.msra.mxu0 %v2382_v29 }
 0x3cd   : > { %2129 = vmatprep.subr.bf16.mxu0 %v2769_v41 }
 0x3ce   : > { %2108 = vmatpush3.bf16.msra.mxu1 %v2383_v30 }
 0x3cf   : > { %2109 = vmatprep.subr.bf16.mxu1 %v2769_v41 }
 0x3d0   : > { %2130 = vmatpush3.bf16.msra.mxu0 %v2384_v31 }
 0x3d1   : > { %2131 = vmatprep.subr.bf16.mxu0 %v2769_v41 }
 0x3d2   : > { %2110 = vmatpush3.bf16.msra.mxu1 %v2385_v32  ;;  %v2416_v32 = vld [vmem:[#allocation14 + $0x30] sm:$0xff]  }
 0x3d3   : > { %2111 = vmatprep.subr.bf16.mxu1 %v2769_v41 }
 0x3d4   : > { %2132 = vmatpush3.bf16.msra.mxu0 %v2386_v33  ;;  %v2417_v33 = vld [vmem:[#allocation14 + $0x38] sm:$0xff]  }
 0x3d5   : > { %2133 = vmatprep.subr.bf16.mxu0 %v2769_v41 }
 0x3d6   : > { %2112 = vmatpush3.bf16.msra.mxu1 %v2387_v34  ;;  %v1887_v34 = vld [vmem:[#allocation13 + $0x1] ss:$0 sm:$0xff] }
 0x3d7   : > { %2113 = vmatprep.subr.bf16.mxu1 %v2769_v41 }
 0x3d8   : > { %2134 = vmatpush3.bf16.msra.mxu0 %v2388_v35 }
 0x3d9   : > { %2135 = vmatprep.subr.bf16.mxu0 %v2769_v41 }
 0x3da   : > { %2114 = vmatpush3.bf16.msra.mxu1 %v2389_v36 }
 0x3db   : > { %2115 = vmatprep.subr.bf16.mxu1 %v2769_v41 }
 0x3dc   : > { %2136 = vmatpush3.bf16.msra.mxu0 %v2390_v37 }
 0x3dd   : > { %2137 = vmatprep.subr.bf16.mxu0 %v2769_v41 }
 0x3de   : > { %2116 = vmatpush3.bf16.msra.mxu1 %v2391_v38 }
 0x3df   : > { %2117 = vmatprep.subr.bf16.mxu1 %v2769_v41 }
 0x3e0   : > { %2138 = vmatpush3.bf16.msra.mxu0 %v2392_v39 }
 0x3e1   : > { %2163 = vmatprep.subr.bf16.mxu0 %v2769_v41 }
 0x3e2   : > { %2118 = vmatpush3.bf16.msra.mxu1 %v2393_v40 }
 0x3e3   : > { %2140 = vmatmul.mubr.bf16.vlgmr.msra.gmra.mrb[12].mxu0 %v1244_v42  ;;  %2143 = vmatprep.subr.bf16.mxu1 %v2769_v41 }
 0x3e4   : > { %2179 = vmatprep.mubr.msk.bf16.mxu0 %vm2770_vm0, %v2769_v41  ;;  %2164 = vmatpush3.bf16.msra.mxu0 %v2402_v51 }
 0x3e5   : > { %2120 = vmatmul.mubr.bf16.vlgmr.msra.gmra.mrb[8].mxu1 %v974_v22  ;;  %2165 = vmatprep.subr.bf16.mxu0 %v2769_v41  ;;  %v2414_v22 = vld [vmem:[#allocation14 + $0x20] sm:$0xff]  }
 0x3e6   : > { %2159 = vmatprep.mubr.msk.bf16.mxu1 %vm2770_vm0, %v2769_v41  ;;  %2144 = vmatpush3.bf16.msra.mxu1 %v2394_v43  ;;  %v1896_v43 = vld [vmem:[#allocation16] ss:$0 sm:$0xff] }
 0x3e7   : > { %2145 = vmatprep.subr.bf16.mxu1 %v2769_v41 }
 0x3e8   : > { %2166 = vmatpush3.bf16.msra.mxu0 %v2403_v52 }
 0x3e9   : > { %2167 = vmatprep.subr.bf16.mxu0 %v2769_v41 }
 0x3ea   : > { %2146 = vmatpush3.bf16.msra.mxu1 %v2395_v44 }
 0x3eb   : > { %2147 = vmatprep.subr.bf16.mxu1 %v2769_v41 }
 0x3ec   : > { %2168 = vmatpush3.bf16.msra.mxu0 %v2404_v53 }
 0x3ed   : > { %2169 = vmatprep.subr.bf16.mxu0 %v2769_v41 }
 0x3ee   : > { %2148 = vmatpush3.bf16.msra.mxu1 %v2396_v45 }
 0x3ef   : > { %2149 = vmatprep.subr.bf16.mxu1 %v2769_v41 }
 0x3f0   : > { %2170 = vmatpush3.bf16.msra.mxu0 %v2405_v54 }
 0x3f1   : > { %2171 = vmatprep.subr.bf16.mxu0 %v2769_v41 }
 0x3f2   : > { %2150 = vmatpush3.bf16.msra.mxu1 %v2397_v46 }
 0x3f3   : > { %2151 = vmatprep.subr.bf16.mxu1 %v2769_v41 }
 0x3f4   : > { %2172 = vmatpush3.bf16.msra.mxu0 %v2406_v55 }
 0x3f5   : > { %2173 = vmatprep.subr.bf16.mxu0 %v2769_v41 }
 0x3f6   : > { %2152 = vmatpush3.bf16.msra.mxu1 %v2398_v47 }
 0x3f7   : > { %2153 = vmatprep.subr.bf16.mxu1 %v2769_v41 }
 0x3f8   : > { %2174 = vmatpush3.bf16.msra.mxu0 %v2407_v56 }
 0x3f9   : > { %2175 = vmatprep.subr.bf16.mxu0 %v2769_v41 }
 0x3fa   : > { %2154 = vmatpush3.bf16.msra.mxu1 %v2399_v48 }
 0x3fb   : > { %2155 = vmatprep.subr.bf16.mxu1 %v2769_v41 }
 0x3fc   : > { %2176 = vmatpush3.bf16.msra.mxu0 %v2408_v16 }
 0x3fd   : > { %2177 = vmatprep.subr.bf16.mxu0 %v2769_v41 }
 0x3fe   : > { %2156 = vmatpush3.bf16.msra.mxu1 %v2400_v49 }
 0x3ff   : > { %2157 = vmatprep.subr.bf16.mxu1 %v2769_v41 }
 0x400   : > { %2178 = vmatpush3.bf16.msra.mxu0 %v2409_v17 }
 0x402   : > { %2158 = vmatpush3.bf16.msra.mxu1 %v2401_v50 }
 0x403   : > { %2183 = vmatprep.subr.bf16.mxu1 %v2769_v41 }
 0x496   : > { %v1148_v57 = vpop.f32.mrb[8].mxu0 }
 0x497   : > { %v2101_v58 = vpop.f32.mrb[9].mxu0 }
 0x498   : > { %v1060_v59 = vpop.f32.mrb[4].mxu1  ;;  %v1151_v60 = vpop.f32.mrb[10].mxu0 }
 0x499   : > { %v1149_v61 = vadd.f32 %v1148_v57, %v1060_v59  ;;  %v2081_v62 = vpop.f32.mrb[5].mxu1  ;;  %v2102_v63 = vpop.f32.mrb[11].mxu0 }
 0x49a   : > { %v1063_v0 = vpop.f32.mrb[6].mxu1 }
 0x49b   : > { %v2082_v1 = vpop.f32.mrb[7].mxu1 }
 0x4b6   : > { %v1328_v2 = vpop.f32.mrb[12].mxu0 }
 0x4b7   : > { %v2141_v3 = vpop.f32.mrb[13].mxu0 }
 0x4b8   : > { %v1236_v4 = vpop.f32.mrb[8].mxu1  ;;  %v1331_v5 = vpop.f32.mrb[14].mxu0 }
 0x4b9   : > { %v1242_v6 = vadd.f32 %v1236_v4, %v1149_v61  ;;  %v2121_v7 = vpop.f32.mrb[9].mxu1  ;;  %v2142_v8 = vpop.f32.mrb[15].mxu0 }
 0x4ba   : > { %v1239_v10 = vpop.f32.mrb[10].mxu1 }
 0x4bb   : > { %v1334_v11 = vadd.f32 %v1328_v2, %v1242_v6  ;;  %v2122_v12 = vpop.f32.mrb[11].mxu1 }
 0x4bd   : > { %v1341_v13 = vadd.f32 %v1877_v9, %v1334_v11 }
 0x4bf   : > { %v1342_v14 = vmax.f32 %v1341_v13, 0.0 }
 0x4c1   : > { %v1343_v15 = vpack.c.bf16 %v1342_v14, %v1342_v14 }
 0x4c3   : > { %2160 = vmatmul.mubr.bf16.vlgmr.msra.gmra.mrb[12].mxu1 %v1343_v15 }
 0x4c4   : > { %2199 = vmatprep.mubr.msk.bf16.mxu1 %vm2770_vm0, %v2769_v41  ;;  %2184 = vmatpush3.bf16.msra.mxu1 %v2410_v18 }
 0x4c5   : > { %2185 = vmatprep.subr.bf16.mxu1 %v2769_v41 }
 0x4c8   : > { %2186 = vmatpush3.bf16.msra.mxu1 %v2411_v19 }
 0x4c9   : > { %2187 = vmatprep.subr.bf16.mxu1 %v2769_v41 }
 0x4cc   : > { %2188 = vmatpush3.bf16.msra.mxu1 %v2412_v20 }
 0x4cd   : > { %2189 = vmatprep.subr.bf16.mxu1 %v2769_v41 }
 0x4d0   : > { %2190 = vmatpush3.bf16.msra.mxu1 %v2413_v21 }
 0x4d1   : > { %2191 = vmatprep.subr.bf16.mxu1 %v2769_v41 }
 0x4d4   : > { %2192 = vmatpush3.bf16.msra.mxu1 %v2414_v22 }
 0x4d5   : > { %2193 = vmatprep.subr.bf16.mxu1 %v2769_v41 }
 0x4d8   : > { %2194 = vmatpush3.bf16.msra.mxu1 %v2415_v23 }
 0x4d9   : > { %2195 = vmatprep.subr.bf16.mxu1 %v2769_v41 }
 0x4dc   : > { %2196 = vmatpush3.bf16.msra.mxu1 %v2416_v32 }
 0x4dd   : > { %2197 = vmatprep.subr.bf16.mxu1 %v2769_v41 }
 0x4e0   : > { %2198 = vmatpush3.bf16.msra.mxu1 %v2417_v33 }
 0x596   : > { %v1432_v25 = vpop.f32.mrb[12].mxu1 }
 0x597   : > { %v1433_v26 = vadd.f32 %v1878_v24, %v1432_v25  ;;  %v2161_v27 = vpop.f32.mrb[13].mxu1 }
 0x598   : > { %v1435_v28 = vpop.f32.mrb[14].mxu1 }
 0x599   : > { %v1438_v29 = vmax.f32 %v1433_v26, 0.0  ;;  %v2162_v30 = vpop.f32.mrb[15].mxu1 }
 0x59b   : > { %v1439_v31 = vpack.c.bf16 %v1438_v29, %v1438_v29 }
 0x59d   : > { %2180 = vmatmul.mubr.bf16.vlgmr.msra.gmra.mrb[16].mxu0 %v1439_v31 }
 0x670   : > { %v1528_v35 = vpop.f32.mrb[16].mxu0 }
 0x671   : > { %v1529_v36 = vadd.f32 %v1887_v34, %v1528_v35  ;;  %v2181_v37 = vpop.f32.mrb[17].mxu0 }
 0x672   : > { %v1531_v38 = vpop.f32.mrb[18].mxu0 }
 0x673   : > { %v1534_v39 = vmax.f32 %v1529_v36, 0.0  ;;  %v2182_v40 = vpop.f32.mrb[19].mxu0 }
 0x675   : > { %v1535_v42 = vpack.c.bf16 %v1534_v39, %v1534_v39 }
 0x677   : > { %2200 = vmatmul.mubr.bf16.vlgmr.msra.gmra.mrb[16].mxu1 %v1535_v42 }
 0x74a   : > { %v1624_v44 = vpop.f32.mrb[16].mxu1 }
 0x74b   : > { %v1625_v41 = vadd.f32 %v1896_v43, %v1624_v44  ;;  %v2201_v45 = vpop.f32.mrb[17].mxu1 }
 0x74c   : > { %v1627_v46 = vpop.f32.mrb[18].mxu1 }
 0x74d   : > { %1630 = vst [vmem:[%s462_s21] sm:$0xff] %v1625_v41  ;;  %v2202_v47 = vpop.f32.mrb[19].mxu1 }
 0x74e   : > { %2685 = shalt.err (!%p2682_p10)
}
 0x74f   : > { %s2686_s9 = scalar_lea.hbm %s3237_s1, 128  ;;  %s2690_s16 = scalar_lea.hbm %s3322_s18, 256 }
 0x750   : > { %p2687_p11 = scmp.ne.s32.totalorder %s3237_s1, %s2686_s9  ;;  %p2691_p7 = scmp.lt.u32.totalorder %s3237_s1, %s3322_s18 }
 0x751   : > { %p2692_p6 = scmp.lt.u32.totalorder %s2690_s16, %s2686_s9  ;;  %p2694_p12 = scmp.lt.u32.totalorder %s2686_s9, %s3237_s1 }
 0x752   : > { %p2688_p3 = pnand %p2687_p11, %p3323_p1 }
 0x753   : > { %p2693_p9 = por %p2692_p6, %p2691_p7 }
 0x754   : > { %p2689_p5 = pneg %p2688_p3 }
 0x755   : > { %p2695_p13 = por %p2694_p12, %p2693_p9 }
 0x757   : > { %p2696_p0 = pnand %p2695_p13, %p2689_p5 }
 0x759   : > { %2699 = shalt.err (!%p2696_p0)
}
 0x75a   : > { %2237 = dma.vmem_to_hbm [thread:$0]  (%p3323_p1), %s3239_s29, 128, %s3237_s1, %s1632_s26  }
 0x75b PF: > { %s1657_s14 = sand.u32 1, %s2742_s30   ;;  %p3324_p2 = scmp.ne.s32.totalorder %s3309_s20, 0 }
 0x75c   : > { %p3325_p8 = scmp.ge.s32.totalorder %s2754_s12, 2  ;;  %s1658_s27 = scalar_lea.sflag [#allocation4], %s1657_s14 }
 0x75e   : > { %p2269_p4 = pnand %p3325_p8, %p3324_p2 }
 0x760   : > { %2737 = dma.done.wait (!%p2269_p4), %s1658_s27, 128  }
 0x761   : > { %2739 = vsyncadd (!%p2269_p4), %s1658_s27, 4294967168  ;;  %p26_p10 = scmp.ge.s32.totalorder %s3052_s19, 4   ;;  %s3326_s30 = smov %s2746_s10 }
 0x762   : > { %s3327_s10 = smov %s2750_s11  ;;  %s3328_s11 = smov %s3063_s25 }
 0x763   : > { %s3329_s12 = smov %s3052_s19  ;;  %28 = sbr.rel (!%p26_p10) target bundleno = 13 (0xd), region = 133 }
 0x76a   :  { %1663 = vsyncpa [#allocation3], 1 }
 0x76b   :  { %1665 = vsyncpa [#allocation3 + $0x1], 1 }
 0x76c   :  { %1666 = vsyncpa [#allocation6], 1 }
 0x76d   :  { %1667 = vsyncpa [#allocation9], 1 }
 0x76e   :  { %1668 = vsyncpa [#allocation12], 1 }
 0x76f   :  { %1669 = vsyncpa [#allocation15], 1 }
 0x770   :  { %1670 = vsyncpa [#allocation4], 1 }
 0x771   :  { %1672 = vsyncpa [#allocation4 + $0x1], 1 }

</bundles_post_ra>
